<compile_context>
chip_gen: v7x
topology: tpu7x:2x2x1
jax: 0.10.0
libtpu: 0.0.40
codegen_flags: <defaults>
</compile_context>

<pallas_src>
import functools

import jax
import jax.numpy as jnp
import numpy as np
from jax.experimental import pallas as pl
from jax.experimental.pallas import tpu as pltpu  # noqa: F401  (TPU backend)


def _swin_highway_v2_kernel(x_ref, wqkv_ref, wproj_ref, bproj_ref,
                            ln_g_ref, ln_b_ref, wcls_ref, bcls_ref,
                            out_ref, *, batch, seq_len, num_heads, ln_eps):
    B, N, H = batch, seq_len, num_heads
    BN, C = x_ref.shape
    D = C // H
    scale = D ** -0.5
    inv_c = 1.0 / C
    inv_n = 1.0 / N
    f32 = jnp.float32
    bf16 = jnp.bfloat16

    # ---- GlobalSparseAttn (sr_ratio=1 -> sampler is Identity) ----
    x = x_ref[...].astype(bf16)                                        # (B*N, C)

    # Fused QKV projection: one lane-dense GEMM with a 3C-wide output.
    qkv = jnp.dot(x, wqkv_ref[...], preferred_element_type=f32)        # (B*N, 3C)

    # qk scale folded into the q extraction (no standalone scale pass on scores).
    q = (qkv[:, 0 * C:1 * C] * scale).reshape(B, N, C).astype(bf16)
    k = qkv[:, 1 * C:2 * C].reshape(B, N, C).astype(bf16)
    v = qkv[:, 2 * C:3 * C].reshape(B, N, C).astype(bf16)

    # Per-head attention.  D is tiny, so these matmuls cannot fill the MXU in
    # any layout; keep them as a short unrolled loop feeding off the single
    # fused QKV result.  Softmax is f32 with an exact divide.
    o_heads = []
    for h in range(H):
        hs = slice(h * D, (h + 1) * D)
        qh, kh, vh = q[:, :, hs], k[:, :, hs], v[:, :, hs]             # (B, N, D)
        s = jnp.einsum("bnd,bmd->bnm", qh, kh,
                       preferred_element_type=f32)                     # (B, N, N)
        s = s - jnp.max(s, axis=-1, keepdims=True)
        p = jnp.exp(s)
        p = p * (1.0 / jnp.sum(p, axis=-1, keepdims=True))
        o_heads.append(jnp.einsum("bnm,bmd->bnd", p.astype(bf16), vh,
                                  preferred_element_type=f32))         # (B, N, D)
    # Heads concatenated on the lane axis once -> (B*N, C) for the proj GEMM.
    o = jnp.concatenate(o_heads, axis=-1).reshape(BN, C).astype(bf16)

    # Output projection: one (B*N, C) @ (C, C) GEMM.
    proj = jnp.dot(o, wproj_ref[...], preferred_element_type=f32)      # (B*N, C)
    proj = proj + bproj_ref[...]

    # ---- SwinHighway classifier: LayerNorm -> token mean-pool -> Linear ----
    mu = jnp.sum(proj, axis=-1, keepdims=True) * inv_c
    xc = proj - mu
    var = jnp.sum(xc * xc, axis=-1, keepdims=True) * inv_c
    normed = xc * jax.lax.rsqrt(var + ln_eps)
    normed = normed * ln_g_ref[...] + ln_b_ref[...]                    # (B*N, C)

    pooled = jnp.sum(normed.reshape(B, N, C), axis=1) * inv_n          # (B, C)

    # Classifier GEMM against a zero-padded (C, W-C) weight so the result is
    # lane-dense; padded logits land right after pooled in the output slab.
    logits_pad = jnp.dot(pooled.astype(bf16), wcls_ref[...],
                         preferred_element_type=f32) + bcls_ref[...]   # (B, W-C)

    # Single lane-dense store of the packed [pooled | logits | 0-pad] slab.
    out_ref[...] = jnp.concatenate([pooled, logits_pad], axis=-1)      # (B, W)


def swin_highway_v2(x, params, *, num_heads=8, ln_eps=1e-5):
    B, N, C = x.shape
    H = num_heads
    assert C % H == 0, "num_features must be divisible by num_heads"
    L = params["w_cls"].shape[1]

    # Packed lane-dense output slab: [pooled (C) | logits (L) | zero pad] per row.
    slab = pl.cdiv(C + L, 128) * 128
    pad = slab - C - L

    # bf16 weight storage (in a real model the parameters would simply be kept
    # in bf16): halves weight DMA bytes; MXU is bf16-native and the kernel
    # requests f32 accumulation.  Biases / LayerNorm affine stay f32.
    w_qkv = params["w_qkv"].astype(jnp.bfloat16)                    # (C, 3C), untouched layout
    w_proj = params["w_proj"].astype(jnp.bfloat16)                  # (C, C)
    w_cls = jnp.pad(params["w_cls"], ((0, 0), (0, pad))).astype(jnp.bfloat16)
    b_cls = jnp.pad(params["b_cls"], ((0, 0), (0, pad)))            # (1, slab - C)

    kernel = functools.partial(_swin_highway_v2_kernel, batch=B, seq_len=N,
                               num_heads=H, ln_eps=ln_eps)

    # Single gridless invocation: at these sizes every operand and intermediate
    # fits trivially in VMEM (default full-array blocks), so a grid would only
    # add per-step pipeline overhead.  See header notes for v7x / large-N plans.
    out = pl.pallas_call(
        kernel,
        out_shape=jax.ShapeDtypeStruct((B, slab), jnp.float32),
    )(x.reshape(B * N, C), w_qkv, w_proj, params["b_proj"],
      params["ln_g"], params["ln_b"], w_cls, b_cls)

    pooled = out[:, :C]
    logits = out[:, C:C + L]
    return logits, pooled


def swin_highway_v2_ref(x, params, *, num_heads=8, ln_eps=1e-5):
    """Pure-JAX f32 reference mirroring the PyTorch forward."""
    B, N, C = x.shape
    D = C // num_heads
    scale = D ** -0.5
    qkv = x @ params["w_qkv"]                                   # (B, N, 3C)
    qkv = qkv.reshape(B, N, 3, num_heads, D).transpose(2, 0, 3, 1, 4)
    q, k, v = qkv[0], qkv[1], qkv[2]                            # (B, H, N, D)
    attn = jnp.einsum("bhnd,bhmd->bhnm", q, k) * scale
    attn = jax.nn.softmax(attn, axis=-1)
    o = jnp.einsum("bhnm,bhmd->bhnd", attn, v)
    o = o.transpose(0, 2, 1, 3).reshape(B, N, C)
    o = o @ params["w_proj"] + params["b_proj"][0]
    mu = jnp.mean(o, axis=-1, keepdims=True)
    var = jnp.mean((o - mu) ** 2, axis=-1, keepdims=True)
    normed = (o - mu) * jax.lax.rsqrt(var + ln_eps)
    normed = normed * params["ln_g"][0] + params["ln_b"][0]
    pooled = jnp.mean(normed, axis=1)                           # (B, C)
    logits = pooled @ params["w_cls"] + params["b_cls"][0]
    return logits, pooled


if __name__ == "__main__":
    # config: embed_dim=32, stage=1 -> num_features C=32; num_labels=10
    # sequence: N=16 tokens (H=W=4), batch B=2, num_heads=8 (head_dim=4)
    B, N, C, L, H = 2, 16, 32, 10, 8

    key = jax.random.PRNGKey(0)
    ks = jax.random.split(key, 6)
    x = jax.random.normal(ks[0], (B, N, C), dtype=jnp.float32)

    params = {
        "w_qkv": jax.random.normal(ks[1], (C, 3 * C), dtype=jnp.float32) * 0.05,
        "w_proj": jax.random.normal(ks[2], (C, C), dtype=jnp.float32) * 0.05,
        "b_proj": jax.random.normal(ks[3], (1, C), dtype=jnp.float32) * 0.01,
        "ln_g": jnp.ones((1, C), dtype=jnp.float32),
        "ln_b": jnp.zeros((1, C), dtype=jnp.float32),
        "w_cls": jax.random.normal(ks[4], (C, L), dtype=jnp.float32) * 0.05,
        "b_cls": jax.random.normal(ks[5], (1, L), dtype=jnp.float32) * 0.01,
    }

    logits, pooled = swin_highway_v2(x, params, num_heads=H)
    jax.block_until_ready((logits, pooled))

    logits_ref, pooled_ref = swin_highway_v2_ref(x, params, num_heads=H)
    # Tolerances account for bf16 matmul operands (f32 accumulation) vs. the
    # all-f32 reference; LayerNorm amplifies the relative matmul error.
    np.testing.assert_allclose(np.asarray(pooled), np.asarray(pooled_ref),
                               rtol=2e-2, atol=2e-2)
    np.testing.assert_allclose(np.asarray(logits), np.asarray(logits_ref),
                               rtol=2e-2, atol=2e-2)

    print("KERNEL_OK")
</pallas_src>

<mosaic_0001>
module attributes {stable_mosaic.version = 11 : i64} {
  func.func @_swin_highway_v2_kernel(%arg0: memref<32x32xf32, #tpu.memory_space<vmem>>, %arg1: memref<32x96xbf16, #tpu.memory_space<vmem>>, %arg2: memref<32x32xbf16, #tpu.memory_space<vmem>>, %arg3: memref<1x32xf32, #tpu.memory_space<vmem>>, %arg4: memref<1x32xf32, #tpu.memory_space<vmem>>, %arg5: memref<1x32xf32, #tpu.memory_space<vmem>>, %arg6: memref<32x96xbf16, #tpu.memory_space<vmem>>, %arg7: memref<1x96xf32, #tpu.memory_space<vmem>>, %arg8: memref<2x128xf32, #tpu.memory_space<vmem>>) attributes {dimension_semantics = [], scalar_prefetch = 0 : i64, scratch_operands = 0 : i64, tpu.core_type = #tpu.core_type<tc>} {
    %c0 = arith.constant 0 : index
    %c0_0 = arith.constant 0 : index
    %0 = vector.load %arg0[%c0, %c0_0] : memref<32x32xf32, #tpu.memory_space<vmem>>, vector<32x32xf32>
    %1 = arith.truncf %0 : vector<32x32xf32> to vector<32x32xbf16>
    %c0_1 = arith.constant 0 : index
    %c0_2 = arith.constant 0 : index
    %2 = vector.load %arg1[%c0_1, %c0_2] : memref<32x96xbf16, #tpu.memory_space<vmem>>, vector<32x96xbf16>
    %cst = arith.constant dense<0.000000e+00> : vector<32x96xf32>
    %3 = tpu.matmul %1, %2, %cst {dimension_numbers = #tpu.dot_dimension_numbers<[1], [0], [0], [1], [0, 0, 1, 1], [], []>} : vector<32x32xbf16>, vector<32x96xbf16>, vector<32x96xf32> -> vector<32x96xf32>
    %4 = vector.extract_strided_slice %3 {offsets = [0, 0], sizes = [32, 32], strides = [1, 1]} : vector<32x96xf32> to vector<32x32xf32>
    %cst_3 = arith.constant 5.000000e-01 : f32
    %5 = vector.broadcast %cst_3 : f32 to vector<32x32xf32>
    %6 = arith.mulf %4, %5 : vector<32x32xf32>
    %7 = vector.shape_cast %6 : vector<32x32xf32> to vector<2x16x32xf32>
    %8 = arith.truncf %7 : vector<2x16x32xf32> to vector<2x16x32xbf16>
    %9 = vector.extract_strided_slice %3 {offsets = [0, 32], sizes = [32, 32], strides = [1, 1]} : vector<32x96xf32> to vector<32x32xf32>
    %10 = vector.shape_cast %9 : vector<32x32xf32> to vector<2x16x32xf32>
    %11 = arith.truncf %10 : vector<2x16x32xf32> to vector<2x16x32xbf16>
    %12 = vector.extract_strided_slice %3 {offsets = [0, 64], sizes = [32, 32], strides = [1, 1]} : vector<32x96xf32> to vector<32x32xf32>
    %13 = vector.shape_cast %12 : vector<32x32xf32> to vector<2x16x32xf32>
    %14 = arith.truncf %13 : vector<2x16x32xf32> to vector<2x16x32xbf16>
    %15 = vector.extract_strided_slice %8 {offsets = [0, 0, 0], sizes = [2, 16, 4], strides = [1, 1, 1]} : vector<2x16x32xbf16> to vector<2x16x4xbf16>
    %16 = vector.extract_strided_slice %11 {offsets = [0, 0, 0], sizes = [2, 16, 4], strides = [1, 1, 1]} : vector<2x16x32xbf16> to vector<2x16x4xbf16>
    %17 = vector.extract_strided_slice %14 {offsets = [0, 0, 0], sizes = [2, 16, 4], strides = [1, 1, 1]} : vector<2x16x32xbf16> to vector<2x16x4xbf16>
    "tpu.trace_start"() <{level = 10 : i32, message = "bnd,bmd->bnm"}> : () -> ()
    %cst_4 = arith.constant dense<0.000000e+00> : vector<2x16x16xf32>
    %18 = tpu.matmul %15, %16, %cst_4 {dimension_numbers = #tpu.dot_dimension_numbers<[2], [2], [1], [1], [0, 0, 0, 1, 1, 1], [0], [0]>} : vector<2x16x4xbf16>, vector<2x16x4xbf16>, vector<2x16x16xf32> -> vector<2x16x16xf32>
    "tpu.trace_stop"() : () -> ()
    %cst_5 = arith.constant dense<0xFF800000> : vector<2x16xf32>
    %19 = vector.multi_reduction <maximumf>, %18, %cst_5 [2] : vector<2x16x16xf32> to vector<2x16xf32>
    %20 = vector.shape_cast %19 : vector<2x16xf32> to vector<2x16x1xf32>
    %21 = vector.broadcast %20 : vector<2x16x1xf32> to vector<2x16x16xf32>
    %22 = arith.subf %18, %21 : vector<2x16x16xf32>
    %23 = math.exp %22 : vector<2x16x16xf32>
    %cst_6 = arith.constant dense<0.000000e+00> : vector<2x16xf32>
    %24 = vector.multi_reduction <add>, %23, %cst_6 [2] : vector<2x16x16xf32> to vector<2x16xf32>
    %25 = vector.shape_cast %24 : vector<2x16xf32> to vector<2x16x1xf32>
    %cst_7 = arith.constant 1.000000e+00 : f32
    %26 = vector.broadcast %cst_7 : f32 to vector<2x16x1xf32>
    %27 = arith.divf %26, %25 : vector<2x16x1xf32>
    %28 = vector.broadcast %27 : vector<2x16x1xf32> to vector<2x16x16xf32>
    %29 = arith.mulf %23, %28 : vector<2x16x16xf32>
    %30 = arith.truncf %29 : vector<2x16x16xf32> to vector<2x16x16xbf16>
    "tpu.trace_start"() <{level = 10 : i32, message = "bnm,bmd->bnd"}> : () -> ()
    %cst_8 = arith.constant dense<0.000000e+00> : vector<2x16x4xf32>
    %31 = tpu.matmul %30, %17, %cst_8 {dimension_numbers = #tpu.dot_dimension_numbers<[2], [1], [1], [2], [0, 0, 0, 1, 1, 2], [0], [0]>} : vector<2x16x16xbf16>, vector<2x16x4xbf16>, vector<2x16x4xf32> -> vector<2x16x4xf32>
    "tpu.trace_stop"() : () -> ()
    %32 = vector.extract_strided_slice %8 {offsets = [0, 0, 4], sizes = [2, 16, 4], strides = [1, 1, 1]} : vector<2x16x32xbf16> to vector<2x16x4xbf16>
    %33 = vector.extract_strided_slice %11 {offsets = [0, 0, 4], sizes = [2, 16, 4], strides = [1, 1, 1]} : vector<2x16x32xbf16> to vector<2x16x4xbf16>
    %34 = vector.extract_strided_slice %14 {offsets = [0, 0, 4], sizes = [2, 16, 4], strides = [1, 1, 1]} : vector<2x16x32xbf16> to vector<2x16x4xbf16>
    "tpu.trace_start"() <{level = 10 : i32, message = "bnd,bmd->bnm"}> : () -> ()
    %cst_9 = arith.constant dense<0.000000e+00> : vector<2x16x16xf32>
    %35 = tpu.matmul %32, %33, %cst_9 {dimension_numbers = #tpu.dot_dimension_numbers<[2], [2], [1], [1], [0, 0, 0, 1, 1, 1], [0], [0]>} : vector<2x16x4xbf16>, vector<2x16x4xbf16>, vector<2x16x16xf32> -> vector<2x16x16xf32>
    "tpu.trace_stop"() : () -> ()
    %cst_10 = arith.constant dense<0xFF800000> : vector<2x16xf32>
    %36 = vector.multi_reduction <maximumf>, %35, %cst_10 [2] : vector<2x16x16xf32> to vector<2x16xf32>
    %37 = vector.shape_cast %36 : vector<2x16xf32> to vector<2x16x1xf32>
    %38 = vector.broadcast %37 : vector<2x16x1xf32> to vector<2x16x16xf32>
    %39 = arith.subf %35, %38 : vector<2x16x16xf32>
    %40 = math.exp %39 : vector<2x16x16xf32>
    %cst_11 = arith.constant dense<0.000000e+00> : vector<2x16xf32>
    %41 = vector.multi_reduction <add>, %40, %cst_11 [2] : vector<2x16x16xf32> to vector<2x16xf32>
    %42 = vector.shape_cast %41 : vector<2x16xf32> to vector<2x16x1xf32>
    %cst_12 = arith.constant 1.000000e+00 : f32
    %43 = vector.broadcast %cst_12 : f32 to vector<2x16x1xf32>
    %44 = arith.divf %43, %42 : vector<2x16x1xf32>
    %45 = vector.broadcast %44 : vector<2x16x1xf32> to vector<2x16x16xf32>
    %46 = arith.mulf %40, %45 : vector<2x16x16xf32>
    %47 = arith.truncf %46 : vector<2x16x16xf32> to vector<2x16x16xbf16>
    "tpu.trace_start"() <{level = 10 : i32, message = "bnm,bmd->bnd"}> : () -> ()
    %cst_13 = arith.constant dense<0.000000e+00> : vector<2x16x4xf32>
    %48 = tpu.matmul %47, %34, %cst_13 {dimension_numbers = #tpu.dot_dimension_numbers<[2], [1], [1], [2], [0, 0, 0, 1, 1, 2], [0], [0]>} : vector<2x16x16xbf16>, vector<2x16x4xbf16>, vector<2x16x4xf32> -> vector<2x16x4xf32>
    "tpu.trace_stop"() : () -> ()
    %49 = vector.extract_strided_slice %8 {offsets = [0, 0, 8], sizes = [2, 16, 4], strides = [1, 1, 1]} : vector<2x16x32xbf16> to vector<2x16x4xbf16>
    %50 = vector.extract_strided_slice %11 {offsets = [0, 0, 8], sizes = [2, 16, 4], strides = [1, 1, 1]} : vector<2x16x32xbf16> to vector<2x16x4xbf16>
    %51 = vector.extract_strided_slice %14 {offsets = [0, 0, 8], sizes = [2, 16, 4], strides = [1, 1, 1]} : vector<2x16x32xbf16> to vector<2x16x4xbf16>
    "tpu.trace_start"() <{level = 10 : i32, message = "bnd,bmd->bnm"}> : () -> ()
    %cst_14 = arith.constant dense<0.000000e+00> : vector<2x16x16xf32>
    %52 = tpu.matmul %49, %50, %cst_14 {dimension_numbers = #tpu.dot_dimension_numbers<[2], [2], [1], [1], [0, 0, 0, 1, 1, 1], [0], [0]>} : vector<2x16x4xbf16>, vector<2x16x4xbf16>, vector<2x16x16xf32> -> vector<2x16x16xf32>
    "tpu.trace_stop"() : () -> ()
    %cst_15 = arith.constant dense<0xFF800000> : vector<2x16xf32>
    %53 = vector.multi_reduction <maximumf>, %52, %cst_15 [2] : vector<2x16x16xf32> to vector<2x16xf32>
    %54 = vector.shape_cast %53 : vector<2x16xf32> to vector<2x16x1xf32>
    %55 = vector.broadcast %54 : vector<2x16x1xf32> to vector<2x16x16xf32>
    %56 = arith.subf %52, %55 : vector<2x16x16xf32>
    %57 = math.exp %56 : vector<2x16x16xf32>
    %cst_16 = arith.constant dense<0.000000e+00> : vector<2x16xf32>
    %58 = vector.multi_reduction <add>, %57, %cst_16 [2] : vector<2x16x16xf32> to vector<2x16xf32>
    %59 = vector.shape_cast %58 : vector<2x16xf32> to vector<2x16x1xf32>
    %cst_17 = arith.constant 1.000000e+00 : f32
    %60 = vector.broadcast %cst_17 : f32 to vector<2x16x1xf32>
    %61 = arith.divf %60, %59 : vector<2x16x1xf32>
    %62 = vector.broadcast %61 : vector<2x16x1xf32> to vector<2x16x16xf32>
    %63 = arith.mulf %57, %62 : vector<2x16x16xf32>
    %64 = arith.truncf %63 : vector<2x16x16xf32> to vector<2x16x16xbf16>
    "tpu.trace_start"() <{level = 10 : i32, message = "bnm,bmd->bnd"}> : () -> ()
    %cst_18 = arith.constant dense<0.000000e+00> : vector<2x16x4xf32>
    %65 = tpu.matmul %64, %51, %cst_18 {dimension_numbers = #tpu.dot_dimension_numbers<[2], [1], [1], [2], [0, 0, 0, 1, 1, 2], [0], [0]>} : vector<2x16x16xbf16>, vector<2x16x4xbf16>, vector<2x16x4xf32> -> vector<2x16x4xf32>
    "tpu.trace_stop"() : () -> ()
    %66 = vector.extract_strided_slice %8 {offsets = [0, 0, 12], sizes = [2, 16, 4], strides = [1, 1, 1]} : vector<2x16x32xbf16> to vector<2x16x4xbf16>
    %67 = vector.extract_strided_slice %11 {offsets = [0, 0, 12], sizes = [2, 16, 4], strides = [1, 1, 1]} : vector<2x16x32xbf16> to vector<2x16x4xbf16>
    %68 = vector.extract_strided_slice %14 {offsets = [0, 0, 12], sizes = [2, 16, 4], strides = [1, 1, 1]} : vector<2x16x32xbf16> to vector<2x16x4xbf16>
    "tpu.trace_start"() <{level = 10 : i32, message = "bnd,bmd->bnm"}> : () -> ()
    %cst_19 = arith.constant dense<0.000000e+00> : vector<2x16x16xf32>
    %69 = tpu.matmul %66, %67, %cst_19 {dimension_numbers = #tpu.dot_dimension_numbers<[2], [2], [1], [1], [0, 0, 0, 1, 1, 1], [0], [0]>} : vector<2x16x4xbf16>, vector<2x16x4xbf16>, vector<2x16x16xf32> -> vector<2x16x16xf32>
    "tpu.trace_stop"() : () -> ()
    %cst_20 = arith.constant dense<0xFF800000> : vector<2x16xf32>
    %70 = vector.multi_reduction <maximumf>, %69, %cst_20 [2] : vector<2x16x16xf32> to vector<2x16xf32>
    %71 = vector.shape_cast %70 : vector<2x16xf32> to vector<2x16x1xf32>
    %72 = vector.broadcast %71 : vector<2x16x1xf32> to vector<2x16x16xf32>
    %73 = arith.subf %69, %72 : vector<2x16x16xf32>
    %74 = math.exp %73 : vector<2x16x16xf32>
    %cst_21 = arith.constant dense<0.000000e+00> : vector<2x16xf32>
    %75 = vector.multi_reduction <add>, %74, %cst_21 [2] : vector<2x16x16xf32> to vector<2x16xf32>
    %76 = vector.shape_cast %75 : vector<2x16xf32> to vector<2x16x1xf32>
    %cst_22 = arith.constant 1.000000e+00 : f32
    %77 = vector.broadcast %cst_22 : f32 to vector<2x16x1xf32>
    %78 = arith.divf %77, %76 : vector<2x16x1xf32>
    %79 = vector.broadcast %78 : vector<2x16x1xf32> to vector<2x16x16xf32>
    %80 = arith.mulf %74, %79 : vector<2x16x16xf32>
    %81 = arith.truncf %80 : vector<2x16x16xf32> to vector<2x16x16xbf16>
    "tpu.trace_start"() <{level = 10 : i32, message = "bnm,bmd->bnd"}> : () -> ()
    %cst_23 = arith.constant dense<0.000000e+00> : vector<2x16x4xf32>
    %82 = tpu.matmul %81, %68, %cst_23 {dimension_numbers = #tpu.dot_dimension_numbers<[2], [1], [1], [2], [0, 0, 0, 1, 1, 2], [0], [0]>} : vector<2x16x16xbf16>, vector<2x16x4xbf16>, vector<2x16x4xf32> -> vector<2x16x4xf32>
    "tpu.trace_stop"() : () -> ()
    %83 = vector.extract_strided_slice %8 {offsets = [0, 0, 16], sizes = [2, 16, 4], strides = [1, 1, 1]} : vector<2x16x32xbf16> to vector<2x16x4xbf16>
    %84 = vector.extract_strided_slice %11 {offsets = [0, 0, 16], sizes = [2, 16, 4], strides = [1, 1, 1]} : vector<2x16x32xbf16> to vector<2x16x4xbf16>
    %85 = vector.extract_strided_slice %14 {offsets = [0, 0, 16], sizes = [2, 16, 4], strides = [1, 1, 1]} : vector<2x16x32xbf16> to vector<2x16x4xbf16>
    "tpu.trace_start"() <{level = 10 : i32, message = "bnd,bmd->bnm"}> : () -> ()
    %cst_24 = arith.constant dense<0.000000e+00> : vector<2x16x16xf32>
    %86 = tpu.matmul %83, %84, %cst_24 {dimension_numbers = #tpu.dot_dimension_numbers<[2], [2], [1], [1], [0, 0, 0, 1, 1, 1], [0], [0]>} : vector<2x16x4xbf16>, vector<2x16x4xbf16>, vector<2x16x16xf32> -> vector<2x16x16xf32>
    "tpu.trace_stop"() : () -> ()
    %cst_25 = arith.constant dense<0xFF800000> : vector<2x16xf32>
    %87 = vector.multi_reduction <maximumf>, %86, %cst_25 [2] : vector<2x16x16xf32> to vector<2x16xf32>
    %88 = vector.shape_cast %87 : vector<2x16xf32> to vector<2x16x1xf32>
    %89 = vector.broadcast %88 : vector<2x16x1xf32> to vector<2x16x16xf32>
    %90 = arith.subf %86, %89 : vector<2x16x16xf32>
    %91 = math.exp %90 : vector<2x16x16xf32>
    %cst_26 = arith.constant dense<0.000000e+00> : vector<2x16xf32>
    %92 = vector.multi_reduction <add>, %91, %cst_26 [2] : vector<2x16x16xf32> to vector<2x16xf32>
    %93 = vector.shape_cast %92 : vector<2x16xf32> to vector<2x16x1xf32>
    %cst_27 = arith.constant 1.000000e+00 : f32
    %94 = vector.broadcast %cst_27 : f32 to vector<2x16x1xf32>
    %95 = arith.divf %94, %93 : vector<2x16x1xf32>
    %96 = vector.broadcast %95 : vector<2x16x1xf32> to vector<2x16x16xf32>
    %97 = arith.mulf %91, %96 : vector<2x16x16xf32>
    %98 = arith.truncf %97 : vector<2x16x16xf32> to vector<2x16x16xbf16>
    "tpu.trace_start"() <{level = 10 : i32, message = "bnm,bmd->bnd"}> : () -> ()
    %cst_28 = arith.constant dense<0.000000e+00> : vector<2x16x4xf32>
    %99 = tpu.matmul %98, %85, %cst_28 {dimension_numbers = #tpu.dot_dimension_numbers<[2], [1], [1], [2], [0, 0, 0, 1, 1, 2], [0], [0]>} : vector<2x16x16xbf16>, vector<2x16x4xbf16>, vector<2x16x4xf32> -> vector<2x16x4xf32>
    "tpu.trace_stop"() : () -> ()
    %100 = vector.extract_strided_slice %8 {offsets = [0, 0, 20], sizes = [2, 16, 4], strides = [1, 1, 1]} : vector<2x16x32xbf16> to vector<2x16x4xbf16>
    %101 = vector.extract_strided_slice %11 {offsets = [0, 0, 20], sizes = [2, 16, 4], strides = [1, 1, 1]} : vector<2x16x32xbf16> to vector<2x16x4xbf16>
    %102 = vector.extract_strided_slice %14 {offsets = [0, 0, 20], sizes = [2, 16, 4], strides = [1, 1, 1]} : vector<2x16x32xbf16> to vector<2x16x4xbf16>
    "tpu.trace_start"() <{level = 10 : i32, message = "bnd,bmd->bnm"}> : () -> ()
    %cst_29 = arith.constant dense<0.000000e+00> : vector<2x16x16xf32>
    %103 = tpu.matmul %100, %101, %cst_29 {dimension_numbers = #tpu.dot_dimension_numbers<[2], [2], [1], [1], [0, 0, 0, 1, 1, 1], [0], [0]>} : vector<2x16x4xbf16>, vector<2x16x4xbf16>, vector<2x16x16xf32> -> vector<2x16x16xf32>
    "tpu.trace_stop"() : () -> ()
    %cst_30 = arith.constant dense<0xFF800000> : vector<2x16xf32>
    %104 = vector.multi_reduction <maximumf>, %103, %cst_30 [2] : vector<2x16x16xf32> to vector<2x16xf32>
    %105 = vector.shape_cast %104 : vector<2x16xf32> to vector<2x16x1xf32>
    %106 = vector.broadcast %105 : vector<2x16x1xf32> to vector<2x16x16xf32>
    %107 = arith.subf %103, %106 : vector<2x16x16xf32>
    %108 = math.exp %107 : vector<2x16x16xf32>
    %cst_31 = arith.constant dense<0.000000e+00> : vector<2x16xf32>
    %109 = vector.multi_reduction <add>, %108, %cst_31 [2] : vector<2x16x16xf32> to vector<2x16xf32>
    %110 = vector.shape_cast %109 : vector<2x16xf32> to vector<2x16x1xf32>
    %cst_32 = arith.constant 1.000000e+00 : f32
    %111 = vector.broadcast %cst_32 : f32 to vector<2x16x1xf32>
    %112 = arith.divf %111, %110 : vector<2x16x1xf32>
    %113 = vector.broadcast %112 : vector<2x16x1xf32> to vector<2x16x16xf32>
    %114 = arith.mulf %108, %113 : vector<2x16x16xf32>
    %115 = arith.truncf %114 : vector<2x16x16xf32> to vector<2x16x16xbf16>
    "tpu.trace_start"() <{level = 10 : i32, message = "bnm,bmd->bnd"}> : () -> ()
    %cst_33 = arith.constant dense<0.000000e+00> : vector<2x16x4xf32>
    %116 = tpu.matmul %115, %102, %cst_33 {dimension_numbers = #tpu.dot_dimension_numbers<[2], [1], [1], [2], [0, 0, 0, 1, 1, 2], [0], [0]>} : vector<2x16x16xbf16>, vector<2x16x4xbf16>, vector<2x16x4xf32> -> vector<2x16x4xf32>
    "tpu.trace_stop"() : () -> ()
    %117 = vector.extract_strided_slice %8 {offsets = [0, 0, 24], sizes = [2, 16, 4], strides = [1, 1, 1]} : vector<2x16x32xbf16> to vector<2x16x4xbf16>
    %118 = vector.extract_strided_slice %11 {offsets = [0, 0, 24], sizes = [2, 16, 4], strides = [1, 1, 1]} : vector<2x16x32xbf16> to vector<2x16x4xbf16>
    %119 = vector.extract_strided_slice %14 {offsets = [0, 0, 24], sizes = [2, 16, 4], strides = [1, 1, 1]} : vector<2x16x32xbf16> to vector<2x16x4xbf16>
    "tpu.trace_start"() <{level = 10 : i32, message = "bnd,bmd->bnm"}> : () -> ()
    %cst_34 = arith.constant dense<0.000000e+00> : vector<2x16x16xf32>
    %120 = tpu.matmul %117, %118, %cst_34 {dimension_numbers = #tpu.dot_dimension_numbers<[2], [2], [1], [1], [0, 0, 0, 1, 1, 1], [0], [0]>} : vector<2x16x4xbf16>, vector<2x16x4xbf16>, vector<2x16x16xf32> -> vector<2x16x16xf32>
    "tpu.trace_stop"() : () -> ()
    %cst_35 = arith.constant dense<0xFF800000> : vector<2x16xf32>
    %121 = vector.multi_reduction <maximumf>, %120, %cst_35 [2] : vector<2x16x16xf32> to vector<2x16xf32>
    %122 = vector.shape_cast %121 : vector<2x16xf32> to vector<2x16x1xf32>
    %123 = vector.broadcast %122 : vector<2x16x1xf32> to vector<2x16x16xf32>
    %124 = arith.subf %120, %123 : vector<2x16x16xf32>
    %125 = math.exp %124 : vector<2x16x16xf32>
    %cst_36 = arith.constant dense<0.000000e+00> : vector<2x16xf32>
    %126 = vector.multi_reduction <add>, %125, %cst_36 [2] : vector<2x16x16xf32> to vector<2x16xf32>
    %127 = vector.shape_cast %126 : vector<2x16xf32> to vector<2x16x1xf32>
    %cst_37 = arith.constant 1.000000e+00 : f32
    %128 = vector.broadcast %cst_37 : f32 to vector<2x16x1xf32>
    %129 = arith.divf %128, %127 : vector<2x16x1xf32>
    %130 = vector.broadcast %129 : vector<2x16x1xf32> to vector<2x16x16xf32>
    %131 = arith.mulf %125, %130 : vector<2x16x16xf32>
    %132 = arith.truncf %131 : vector<2x16x16xf32> to vector<2x16x16xbf16>
    "tpu.trace_start"() <{level = 10 : i32, message = "bnm,bmd->bnd"}> : () -> ()
    %cst_38 = arith.constant dense<0.000000e+00> : vector<2x16x4xf32>
    %133 = tpu.matmul %132, %119, %cst_38 {dimension_numbers = #tpu.dot_dimension_numbers<[2], [1], [1], [2], [0, 0, 0, 1, 1, 2], [0], [0]>} : vector<2x16x16xbf16>, vector<2x16x4xbf16>, vector<2x16x4xf32> -> vector<2x16x4xf32>
    "tpu.trace_stop"() : () -> ()
    %134 = vector.extract_strided_slice %8 {offsets = [0, 0, 28], sizes = [2, 16, 4], strides = [1, 1, 1]} : vector<2x16x32xbf16> to vector<2x16x4xbf16>
    %135 = vector.extract_strided_slice %11 {offsets = [0, 0, 28], sizes = [2, 16, 4], strides = [1, 1, 1]} : vector<2x16x32xbf16> to vector<2x16x4xbf16>
    %136 = vector.extract_strided_slice %14 {offsets = [0, 0, 28], sizes = [2, 16, 4], strides = [1, 1, 1]} : vector<2x16x32xbf16> to vector<2x16x4xbf16>
    "tpu.trace_start"() <{level = 10 : i32, message = "bnd,bmd->bnm"}> : () -> ()
    %cst_39 = arith.constant dense<0.000000e+00> : vector<2x16x16xf32>
    %137 = tpu.matmul %134, %135, %cst_39 {dimension_numbers = #tpu.dot_dimension_numbers<[2], [2], [1], [1], [0, 0, 0, 1, 1, 1], [0], [0]>} : vector<2x16x4xbf16>, vector<2x16x4xbf16>, vector<2x16x16xf32> -> vector<2x16x16xf32>
    "tpu.trace_stop"() : () -> ()
    %cst_40 = arith.constant dense<0xFF800000> : vector<2x16xf32>
    %138 = vector.multi_reduction <maximumf>, %137, %cst_40 [2] : vector<2x16x16xf32> to vector<2x16xf32>
    %139 = vector.shape_cast %138 : vector<2x16xf32> to vector<2x16x1xf32>
    %140 = vector.broadcast %139 : vector<2x16x1xf32> to vector<2x16x16xf32>
    %141 = arith.subf %137, %140 : vector<2x16x16xf32>
    %142 = math.exp %141 : vector<2x16x16xf32>
    %cst_41 = arith.constant dense<0.000000e+00> : vector<2x16xf32>
    %143 = vector.multi_reduction <add>, %142, %cst_41 [2] : vector<2x16x16xf32> to vector<2x16xf32>
    %144 = vector.shape_cast %143 : vector<2x16xf32> to vector<2x16x1xf32>
    %cst_42 = arith.constant 1.000000e+00 : f32
    %145 = vector.broadcast %cst_42 : f32 to vector<2x16x1xf32>
    %146 = arith.divf %145, %144 : vector<2x16x1xf32>
    %147 = vector.broadcast %146 : vector<2x16x1xf32> to vector<2x16x16xf32>
    %148 = arith.mulf %142, %147 : vector<2x16x16xf32>
    %149 = arith.truncf %148 : vector<2x16x16xf32> to vector<2x16x16xbf16>
    "tpu.trace_start"() <{level = 10 : i32, message = "bnm,bmd->bnd"}> : () -> ()
    %cst_43 = arith.constant dense<0.000000e+00> : vector<2x16x4xf32>
    %150 = tpu.matmul %149, %136, %cst_43 {dimension_numbers = #tpu.dot_dimension_numbers<[2], [1], [1], [2], [0, 0, 0, 1, 1, 2], [0], [0]>} : vector<2x16x16xbf16>, vector<2x16x4xbf16>, vector<2x16x4xf32> -> vector<2x16x4xf32>
    "tpu.trace_stop"() : () -> ()
    %151 = tpu.concatenate %31, %48, %65, %82, %99, %116, %133, %150 in 2 : vector<2x16x4xf32>, vector<2x16x4xf32>, vector<2x16x4xf32>, vector<2x16x4xf32>, vector<2x16x4xf32>, vector<2x16x4xf32>, vector<2x16x4xf32>, vector<2x16x4xf32> -> vector<2x16x32xf32>
    %152 = vector.shape_cast %151 : vector<2x16x32xf32> to vector<32x32xf32>
    %153 = arith.truncf %152 : vector<32x32xf32> to vector<32x32xbf16>
    %c0_44 = arith.constant 0 : index
    %c0_45 = arith.constant 0 : index
    %154 = vector.load %arg2[%c0_44, %c0_45] : memref<32x32xbf16, #tpu.memory_space<vmem>>, vector<32x32xbf16>
    %cst_46 = arith.constant dense<0.000000e+00> : vector<32x32xf32>
    %155 = tpu.matmul %153, %154, %cst_46 {dimension_numbers = #tpu.dot_dimension_numbers<[1], [0], [0], [1], [0, 0, 1, 1], [], []>} : vector<32x32xbf16>, vector<32x32xbf16>, vector<32x32xf32> -> vector<32x32xf32>
    %c0_47 = arith.constant 0 : index
    %c0_48 = arith.constant 0 : index
    %156 = vector.load %arg3[%c0_47, %c0_48] : memref<1x32xf32, #tpu.memory_space<vmem>>, vector<1x32xf32>
    %157 = vector.broadcast %156 : vector<1x32xf32> to vector<32x32xf32>
    %158 = arith.addf %155, %157 : vector<32x32xf32>
    %cst_49 = arith.constant dense<0.000000e+00> : vector<32xf32>
    %159 = vector.multi_reduction <add>, %158, %cst_49 [1] : vector<32x32xf32> to vector<32xf32>
    %160 = vector.shape_cast %159 : vector<32xf32> to vector<32x1xf32>
    %cst_50 = arith.constant 3.125000e-02 : f32
    %161 = vector.broadcast %cst_50 : f32 to vector<32x1xf32>
    %162 = arith.mulf %160, %161 : vector<32x1xf32>
    %163 = vector.broadcast %162 : vector<32x1xf32> to vector<32x32xf32>
    %164 = arith.subf %158, %163 : vector<32x32xf32>
    %165 = arith.mulf %164, %164 : vector<32x32xf32>
    %cst_51 = arith.constant dense<0.000000e+00> : vector<32xf32>
    %166 = vector.multi_reduction <add>, %165, %cst_51 [1] : vector<32x32xf32> to vector<32xf32>
    %167 = vector.shape_cast %166 : vector<32xf32> to vector<32x1xf32>
    %cst_52 = arith.constant 3.125000e-02 : f32
    %168 = vector.broadcast %cst_52 : f32 to vector<32x1xf32>
    %169 = arith.mulf %167, %168 : vector<32x1xf32>
    %cst_53 = arith.constant 9.99999974E-6 : f32
    %170 = vector.broadcast %cst_53 : f32 to vector<32x1xf32>
    %171 = arith.addf %169, %170 : vector<32x1xf32>
    %172 = math.rsqrt %171 : vector<32x1xf32>
    %173 = vector.broadcast %172 : vector<32x1xf32> to vector<32x32xf32>
    %174 = arith.mulf %164, %173 : vector<32x32xf32>
    %c0_54 = arith.constant 0 : index
    %c0_55 = arith.constant 0 : index
    %175 = vector.load %arg4[%c0_54, %c0_55] : memref<1x32xf32, #tpu.memory_space<vmem>>, vector<1x32xf32>
    %176 = vector.broadcast %175 : vector<1x32xf32> to vector<32x32xf32>
    %177 = arith.mulf %174, %176 : vector<32x32xf32>
    %c0_56 = arith.constant 0 : index
    %c0_57 = arith.constant 0 : index
    %178 = vector.load %arg5[%c0_56, %c0_57] : memref<1x32xf32, #tpu.memory_space<vmem>>, vector<1x32xf32>
    %179 = vector.broadcast %178 : vector<1x32xf32> to vector<32x32xf32>
    %180 = arith.addf %177, %179 : vector<32x32xf32>
    %181 = vector.shape_cast %180 : vector<32x32xf32> to vector<2x16x32xf32>
    %cst_58 = arith.constant dense<0.000000e+00> : vector<2x32xf32>
    %182 = vector.multi_reduction <add>, %181, %cst_58 [1] : vector<2x16x32xf32> to vector<2x32xf32>
    %cst_59 = arith.constant 6.250000e-02 : f32
    %183 = vector.broadcast %cst_59 : f32 to vector<2x32xf32>
    %184 = arith.mulf %182, %183 : vector<2x32xf32>
    %185 = arith.truncf %184 : vector<2x32xf32> to vector<2x32xbf16>
    %c0_60 = arith.constant 0 : index
    %c0_61 = arith.constant 0 : index
    %186 = vector.load %arg6[%c0_60, %c0_61] : memref<32x96xbf16, #tpu.memory_space<vmem>>, vector<32x96xbf16>
    %cst_62 = arith.constant dense<0.000000e+00> : vector<2x96xf32>
    %187 = tpu.matmul %185, %186, %cst_62 {dimension_numbers = #tpu.dot_dimension_numbers<[1], [0], [0], [1], [0, 0, 1, 1], [], []>} : vector<2x32xbf16>, vector<32x96xbf16>, vector<2x96xf32> -> vector<2x96xf32>
    %c0_63 = arith.constant 0 : index
    %c0_64 = arith.constant 0 : index
    %188 = vector.load %arg7[%c0_63, %c0_64] : memref<1x96xf32, #tpu.memory_space<vmem>>, vector<1x96xf32>
    %189 = vector.broadcast %188 : vector<1x96xf32> to vector<2x96xf32>
    %190 = arith.addf %187, %189 : vector<2x96xf32>
    %191 = tpu.concatenate %184, %190 in 1 : vector<2x32xf32>, vector<2x96xf32> -> vector<2x128xf32>
    %c0_65 = arith.constant 0 : index
    %c0_66 = arith.constant 0 : index
    %192 = vector.load %arg8[%c0_65, %c0_66] : memref<2x128xf32, #tpu.memory_space<vmem>>, vector<2x128xf32>
    tpu.vector_store %arg8[%c0_65, %c0_66], %191 {strides = array<i32>} : memref<2x128xf32, #tpu.memory_space<vmem>>, vector<2x128xf32>,
    return
  }
}

</mosaic_0001>

<bundles_post_ra>
// kernel: tpu_custom_call.1
= control target key start
LH: loop header
LB: loop body
LE: loop exit
PB: predicated region body
PF: predicated region fallthrough
CT: control target
= control target key end

     0   :  { %13 = vsyncpa [#allocation3], 0  ;;  %s3838_s0 = inlined_call_operand.hbm [shape: f32[32,32], index: 0, kind: input, shape index: {}]   ;;  %s3839_s1 = inlined_call_operand.hbm [shape: bf16[32,96], index: 1, kind: input, shape index: {}]   ;;  %s3840_s2 = inlined_call_operand.hbm [shape: bf16[32,32], index: 2, kind: input, shape index: {}]   ;;  %s3841_s3 = inlined_call_operand.vmem [shape: f32[1,32], index: 3, kind: input, shape index: {}]   ;;  %s3842_s4 = inlined_call_operand.vmem [shape: f32[1,32], index: 4, kind: input, shape index: {}]   ;;  %s3843_s5 = inlined_call_operand.vmem [shape: f32[1,32], index: 5, kind: input, shape index: {}]   ;;  %s3844_s6 = inlined_call_operand.vmem [shape: bf16[32,96], index: 6, kind: input, shape index: {}]   ;;  %s3845_s7 = inlined_call_operand.vmem [shape: f32[1,96], index: 7, kind: input, shape index: {}]   ;;  %s3846_s8 = inlined_call_operand.hbm [shape: f32[2,128], index: 8, kind: output, shape index: {}]  }
   0x1   :  { %14 = vsyncpa [#allocation6], 0 }
   0x2   :  { %15 = vsyncpa [#allocation4], 0  ;;  %s3230_s27 = smov [#allocation5]   ;;  %s3136_s9 = scalar_lea.hbm %s3839_s1, 256 }
   0x3   :  { %s33_s28 = sshll.u32 %s3230_s27, 4  ;;  %p3137_p0 = scmp.ne.s32.totalorder %s3839_s1, %s3136_s9  ;;  %s34_s28 = int_to_ptr.vmem [resolvable:$true] %s33_s28 }
   0x4   :  { %p3140_p1 = scmp.lt.u32.totalorder %s3136_s9, %s3839_s1 }
   0x6   :  { %p3142_p2 = pnand %p3140_p1, %p3137_p0 }
   0x8   :  { %3145 = shalt.err (!%p3142_p2)
}
   0x9   :  { %s3146_s14 = scalar_lea.vmem %s34_s28, 256  ;;  %p3151_p4 = scmp.lt.s32.totalorder %s34_s28, %s34_s28 }
   0xa   :  { %p3147_p3 = scmp.ne.s32.totalorder %s34_s28, %s3146_s14  ;;  %p3152_p5 = scmp.lt.s32.totalorder %s3146_s14, %s3146_s14 }
   0xc   :  { %p3153_p6 = por %p3152_p5, %p3151_p4 }
   0xe   :  { %p3154_p7 = pnand %p3153_p6, %p3147_p3 }
  0x10   :  { %3157 = shalt.err (!%p3154_p7)
}
  0x11   :  { %s3231_s15 = smov 64   ;;  %s3232_s16 = smov 4  }
  0x12   :  { %39 = dma.hbm_to_vmem [thread:$0]  %s3839_s1, 256, %s34_s28, [#allocation6], %s3231_s15, %s3231_s15, %s3232_s16  }
  0x13   :  { %s3233_s19 = smov [#allocation2]   ;;  %s3158_s23 = scalar_lea.hbm %s3838_s0, 512 }
  0x14   :  { %s21_s20 = sshll.u32 %s3233_s19, 4  ;;  %p3159_p8 = scmp.ne.s32.totalorder %s3838_s0, %s3158_s23  ;;  %s22_s20 = int_to_ptr.vmem [resolvable:$true] %s21_s20 }
  0x15   :  { %p3162_p9 = scmp.lt.u32.totalorder %s3158_s23, %s3838_s0 }
  0x17   :  { %p3164_p10 = pnand %p3162_p9, %p3159_p8 }
  0x19   :  { %3167 = shalt.err (!%p3164_p10)
}
  0x1a   :  { %s3168_s29 = scalar_lea.vmem %s22_s20, 512  ;;  %p3173_p12 = scmp.lt.s32.totalorder %s22_s20, %s22_s20 }
  0x1b   :  { %p3169_p11 = scmp.ne.s32.totalorder %s22_s20, %s3168_s29  ;;  %p3174_p13 = scmp.lt.s32.totalorder %s3168_s29, %s3168_s29 }
  0x1d   :  { %p3175_p0 = por %p3174_p13, %p3173_p12 }
  0x1f   :  { %p3176_p1 = pnand %p3175_p0, %p3169_p11 }
  0x21   :  { %3179 = shalt.err (!%p3176_p1)
}
  0x22   :  { %s3234_s1 = smov 128   ;;  %s3235_s28 = smov 8  }
  0x23   :  { %27 = dma.hbm_to_vmem [thread:$0]  %s3838_s0, 512, %s22_s20, [#allocation3], %s3234_s1, %s3234_s1, %s3235_s28  }
  0x24   :  { %s3236_s10 = smov [#allocation7]   ;;  %s3180_s14 = scalar_lea.hbm %s3840_s2, 256 }
  0x25   :  { %s45_s11 = sshll.u32 %s3236_s10, 4  ;;  %p3181_p2 = scmp.ne.s32.totalorder %s3840_s2, %s3180_s14  ;;  %s46_s11 = int_to_ptr.vmem [resolvable:$true] %s45_s11 }
  0x26   :  { %p3184_p3 = scmp.lt.u32.totalorder %s3180_s14, %s3840_s2 }
  0x28   :  { %p3186_p4 = pnand %p3184_p3, %p3181_p2 }
  0x2a   :  { %3189 = shalt.err (!%p3186_p4)
}
  0x2b   :  { %s3190_s22 = scalar_lea.vmem %s46_s11, 256  ;;  %p3195_p6 = scmp.lt.s32.totalorder %s46_s11, %s46_s11 }
  0x2c   :  { %p3191_p5 = scmp.ne.s32.totalorder %s46_s11, %s3190_s22  ;;  %p3196_p7 = scmp.lt.s32.totalorder %s3190_s22, %s3190_s22 }
  0x2e   :  { %p3197_p8 = por %p3196_p7, %p3195_p6 }
  0x30   :  { %p3198_p9 = pnand %p3197_p8, %p3191_p5 }
  0x32   :  { %3201 = shalt.err (!%p3198_p9)
}
  0x33   :  { %51 = dma.hbm_to_vmem [thread:$0]  %s3840_s2, 256, %s46_s11, [#allocation6], %s3231_s15, %s3231_s15, %s3232_s16  }
  0x34   :  { %3224 = dma.done.wait [#allocation3], 512  }
  0x35   :  { %3225 = vsyncadd [#allocation3], 4294966784 }
  0x36   :  { %3226 = dma.done.wait [#allocation6], 512  }
  0x37   :  { %3227 = vsyncadd [#allocation6], 4294966784  ;;  %v2994_v0 = vld [vmem:[#allocation5] sm:$0xff]   ;;  %v2995_v1 = vld [vmem:[#allocation5 + $0x8] sm:$0xff]   ;;  %vm94_vm0 = vcmask 261120   ;;  %v3237_v8 = vmov 0.0  }
  0x38   :  { %2670 = vmatprep.subr.bf16.mxu0 %v2994_v0  ;;  %v72_v2 = vld [vmem:[#allocation2] sm:$0xff]  ;;  %v73_v3 = vld [vmem:[#allocation2 + $0x8] sm:$0xff]  ;;  %v74_v4 = vld [vmem:[#allocation2 + $0x10] sm:$0xff]  ;;  %2678 = vmatprep.subr.bf16.mxu1 %v3237_v8  ;;  %vm3238_vm1 = vmmov 0   ;;  %s3239_s2 = smov 96   ;;  %vm161_vm2 = vcmask 31744  }
  0x39   :  { %2671 = vmatpush3.bf16.msra.mxu0 %v2994_v0  ;;  %v76_v5 = vpack.c.bf16 %v73_v3, %v72_v2  ;;  %v75_v6 = vld [vmem:[#allocation2 + $0x18] sm:$0xff]  ;;  %2680 = vmatprep.mubr.msk.bf16.mxu1 %vm3238_vm1, %v3237_v8  ;;  %vm259_vm3 = vcmask 130048   ;;  %s3240_s23 = smov 92   ;;  %s3242_s24 = smov 60   ;;  %vm2244_vm4 = vcmask 64512   ;;  %vm2249_vm5 = vcmask 97280  }
  0x3a   :  { %2672 = vmatprep.subr.bf16.mxu0 %v2995_v1  ;;  %v77_v7 = vpack.c.bf16 %v75_v6, %v74_v4  ;;  %s3243_s25 = smov 88   ;;  %s3244_s26 = smov 120   ;;  %vm2258_vm6 = vcmask 162816   ;;  %vm2263_vm7 = vcmask 195584   ;;  %vm2268_vm8 = vcmask 228352  }
  0x3b   :  { %2674 = vmatprep.mubr.msk.bf16.mxu0 %vm94_vm0, %v76_v5  ;;  %s3245_s27 = smov 56   ;;  %s3246_s29 = smov 84   ;;  %vm2464_vm9 = vcmask 1041409  }
  0x3c   :  { %s3247_s1 = smov 116   ;;  %s3248_s30 = smov 52  }
  0x3d   :  { %2673 = vmatpush3.bf16.msra.mxu0 %v2995_v1  ;;  %s3249_s9 = smov 80   ;;  %s3250_s10 = smov 112  }
  0x3e   :  { %2684 = vmatprep.subr.bf16.mxu0 %v3237_v8  ;;  %s3251_s11 = smov 48   ;;  %s3252_s12 = smov 76  }
  0x3f   :  { %s3253_s13 = smov 108   ;;  %s3254_s14 = smov 44  }
  0x40   :  { %2675 = vmatmul.mubr.msk.bf16.vlgmr.msra.gmra.mrb[0].mxu0 %vm94_vm0, %v77_v7  ;;  %s3255_s17 = smov 72   ;;  %s3256_s18 = smov 104  }
  0x41   :  { %2686 = vmatprep.mubr.msk.bf16.mxu0 %vm3238_vm1, %v3237_v8  ;;  %s3257_s19 = smov 40   ;;  %s3258_s21 = smov 68  }
  0x42   :  { %s3259_s22 = smov 100   ;;  %s3260_s0 = smov 36  }
  0x43   :  { %s3261_s20 = smov 12  }
 0x113   :  { %v2676_v9 = vpop.f32.mrb[0].mxu0 }
 0x114   :  { %v135_v10 = vpop.f32.mrb[1].mxu0  ;;  %v152_v12 = vmul.f32 0.5, %v2676_v9 }
 0x115   :  { %v2677_v11 = vpop.f32.mrb[2].mxu0  ;;  %v150_v16 = vmul.f32 0.5, %v135_v10 }
 0x116   :  { %v153_v13 = vmul.f32 0.5, %v2677_v11  ;;  %v3364_v14 = vpack.c.bf16 %v2677_v11, %v2676_v9  ;;  %v138_v15 = vpop.f32.mrb[3].mxu0 }
 0x117   :  { %v151_v17 = vmul.f32 0.5, %v138_v15  ;;  %v3366_v18 = vpack.c.bf16 %v138_v15, %v135_v10 }
 0x118   :  { %v3368_v19 = vpack.c.bf16 %v153_v13, %v152_v12 }
 0x119   :  { %v3370_v20 = vpack.c.bf16 %v151_v17, %v150_v16  ;;  %159 = vrot.lane.b32.xlu0 %v3366_v18, %s3239_s2 }
 0x11d   :  { %210 = vrot.lane.b32.xlu0 %v3364_v14, %s3239_s2  ;;  %s3263_s2 = smov 20  }
 0x18b   :  { %v160_v21 = vpop.permute.xlu0 %159 }
 0x18c   :  { %v166_v22 = vsel %vm161_vm2, %v160_v21, 0 }
 0x18d   :  { %2679 = vmatpush3.bf16.xpose.msra.mxu1 %v166_v22 }
 0x18e   :  { %2690 = vmatprep.subr.bf16.mxu1 %v3237_v8 }
 0x18f   :  { %v211_v23 = vpop.permute.xlu0 %210 }
 0x190   :  { %v216_v24 = vsel %vm161_vm2, %v211_v23, 0 }
 0x191   :  { %2685 = vmatpush3.bf16.xpose.msra.mxu0 %v216_v24 }
 0x192   :  { %2696 = vmatprep.subr.bf16.mxu0 %v3237_v8 }
 0x194   :  { %2681 = vmatmul.mubr.msk.bf16.vlgmr.msra.gmra.mrb[0].mxu1 %vm161_vm2, %v3370_v20 }
 0x195   :  { %2692 = vmatprep.mubr.msk.bf16.mxu1 %vm3238_vm1, %v3237_v8 }
 0x198   :  { %2687 = vmatmul.mubr.msk.bf16.vlgmr.msra.gmra.mrb[4].mxu0 %vm161_vm2, %v3368_v19 }
 0x199   :  { %2698 = vmatprep.mubr.msk.bf16.mxu0 %vm3238_vm1, %v3237_v8 }
 0x267   :  { %v202_v25 = vpop.f32.mrb[0].mxu1 }
 0x268   :  { %v2682_v26 = vpop.f32.mrb[1].mxu1  ;;  %v260_v27 = vsel %vm259_vm3, %v202_v25, -inf }
 0x269   :  { %261 = vmax.xlane.f32.xlu1 %v260_v27  ;;  %v205_v28 = vpop.f32.mrb[2].mxu1 }
 0x26a   :  { %v2683_v29 = vpop.f32.mrb[3].mxu1  ;;  %v263_v33 = vsel %vm259_vm3, %v205_v28, -inf }
 0x26b   :  { %v252_v30 = vpop.f32.mrb[4].mxu0 }
 0x26c   :  { %v2688_v31 = vpop.f32.mrb[5].mxu0  ;;  %v266_v32 = vsel %vm259_vm3, %v252_v30, -inf }
 0x26d   :  { %267 = vmax.xlane.f32.xlu0 %v266_v32  ;;  %v255_v34 = vpop.f32.mrb[6].mxu0  ;;  %264 = vmax.xlane.f32.xlu1 %v263_v33 }
 0x26e   :  { %v2689_v35 = vpop.f32.mrb[7].mxu0  ;;  %v269_v36 = vsel %vm259_vm3, %v255_v34, -inf }
 0x271   :  { %270 = vmax.xlane.f32.xlu1 %v269_v36 }
 0x282   :  { %310 = vrot.lane.b32.xlu1 %v3366_v18, %s3231_s15 }
 0x283   :  { %357 = vrot.lane.b32.xlu0 %v3364_v14, %s3231_s15  ;;  %s3241_s15 = smov 124  }
 0x286   :  { %407 = vrot.lane.b32.xlu1 %v3366_v18, %s3240_s23 }
 0x28a   :  { %459 = vrot.lane.b32.xlu1 %v3364_v14, %s3240_s23  ;;  %s3265_s23 = smov 28  }
 0x2f6   :  { %v262_v37 = vpop.xlane.xlu1 %261 }
 0x2f7   :  { %v272_v38 = vsub.f32 %v202_v25, %v262_v37 }
 0x2f9   :  { %v276_v42 = vmul.f32 1.442695, %v272_v38 }
 0x2fa   :  { %v268_v39 = vpop.xlane.xlu0 %267  ;;  %v265_v40 = vpop.xlane.xlu1 %264 }
 0x2fb   :  { %v274_v41 = vsub.f32 %v252_v30, %v268_v39  ;;  %v273_v47 = vsub.f32 %v205_v28, %v265_v40 }
 0x2fd   :  { %v280_v43 = vmul.f32 1.442695, %v274_v41  ;;  %v278_v50 = vmul.f32 1.442695, %v273_v47 }
 0x2fe   :  { %v358_v44 = vpop.permute.xlu0 %357  ;;  %v271_v45 = vpop.xlane.xlu1 %270 }
 0x2ff   :  { %3000 = vpow2.f32 %v280_v43  ;;  %v275_v46 = vsub.f32 %v255_v34, %v271_v45  ;;  %2697 = vmatpush3.bf16.msra.mxu0 %v358_v44 }
 0x300   :  { %2708 = vmatprep.subr.bf16.mxu0 %v3237_v8  ;;  %3002 = vpow2.f32 %v276_v42 }
 0x301   :  { %v282_v48 = vmul.f32 1.442695, %v275_v46 }
 0x302   :  { %v311_v49 = vpop.permute.xlu1 %310 }
 0x303   :  { %2691 = vmatpush3.bf16.msra.mxu1 %v311_v49  ;;  %3004 = vpow2.f32 %v282_v48 }
 0x304   :  { %2702 = vmatprep.subr.bf16.mxu1 %v3237_v8  ;;  %3006 = vpow2.f32 %v278_v50 }
 0x306   :  { %v408_v59 = vpop.permute.xlu1 %407 }
 0x307   :  { %v413_v15 = vsel %vm161_vm2, %v408_v59, 0 }
 0x309   :  { %v3001_v51 = vpop.eup %3000 }
 0x30a   :  { %v290_v52 = vsel %vm259_vm3, %v3001_v51, 0.0  ;;  %v3003_v53 = vpop.eup %3002  ;;  %v460_v60 = vpop.permute.xlu1 %459 }
 0x30b   :  { %291 = vadd.xlane.f32.xlu1 %v290_v52  ;;  %v284_v54 = vsel %vm259_vm3, %v3003_v53, 0.0  ;;  %v465_v9 = vsel %vm161_vm2, %v460_v60, 0 }
 0x30d   :  { %v3005_v55 = vpop.eup %3004 }
 0x30e   :  { %v293_v56 = vsel %vm259_vm3, %v3005_v55, 0.0  ;;  %v3007_v57 = vpop.eup %3006 }
 0x30f   :  { %285 = vadd.xlane.f32.xlu1 %v284_v54  ;;  %v287_v58 = vsel %vm259_vm3, %v3007_v57, 0.0 }
 0x313   :  { %294 = vadd.xlane.f32.xlu1 %v293_v56 }
 0x317   :  { %288 = vadd.xlane.f32.xlu1 %v287_v58 }
 0x328   :  { %405 = vrot.lane.b32.xlu1 %v3370_v20, %s3241_s15 }
 0x32c   :  { %457 = vrot.lane.b32.xlu1 %v3368_v19, %s3241_s15 }
 0x398   :  { %v292_v61 = vpop.xlane.xlu1 %291 }
 0x399   :  { %3008 = vrcp.f32 %v292_v61 }
 0x39c   :  { %v286_v62 = vpop.xlane.xlu1 %285 }
 0x3a0   :  { %v295_v63 = vpop.xlane.xlu1 %294 }
 0x3a1   :  { %3010 = vrcp.f32 %v295_v63 }
 0x3a2   :  { %3012 = vrcp.f32 %v286_v62 }
 0x3a3   :  { %v3009_v1 = vpop.eup %3008 }
 0x3a4   :  { %v289_v0 = vpop.xlane.xlu1 %288  ;;  %v306_v3 = vmul.f32 %v3009_v1, %v3001_v51 }
 0x3a5   :  { %3014 = vrcp.f32 %v289_v0 }
 0x3a8   :  { %v406_v12 = vpop.permute.xlu1 %405 }
 0x3ab   :  { %v3011_v2 = vpop.eup %3010 }
 0x3ac   :  { %v307_v4 = vmul.f32 %v3011_v2, %v3005_v55  ;;  %v3013_v5 = vpop.eup %3012  ;;  %v458_v16 = vpop.permute.xlu1 %457 }
 0x3ad   :  { %v304_v10 = vmul.f32 %v3013_v5, %v3003_v53 }
 0x3ae   :  { %v309_v6 = vpack.c.bf16 %v307_v4, %v306_v3 }
 0x3af   :  { %v3015_v7 = vpop.eup %3014 }
 0x3b0   :  { %v305_v11 = vmul.f32 %v3015_v7, %v3007_v57  ;;  %2699 = vmatmul.mubr.msk.bf16.vlgmr.msra.gmra.mrb[8].mxu0 %vm259_vm3, %v309_v6 }
 0x3b1   :  { %2709 = vmatpush3.bf16.xpose.msra.mxu0 %v465_v9  ;;  %2710 = vmatprep.mubr.msk.bf16.mxu0 %vm3238_vm1, %v3237_v8 }
 0x3b2   :  { %v308_v13 = vpack.c.bf16 %v305_v11, %v304_v10  ;;  %2720 = vmatprep.subr.bf16.mxu0 %v3237_v8 }
 0x3b4   :  { %2693 = vmatmul.mubr.msk.bf16.vlgmr.msra.gmra.mrb[4].mxu1 %vm259_vm3, %v308_v13 }
 0x3b5   :  { %2703 = vmatpush3.bf16.xpose.msra.mxu1 %v413_v15  ;;  %2704 = vmatprep.mubr.msk.bf16.mxu1 %vm3238_vm1, %v3237_v8 }
 0x3b6   :  { %2714 = vmatprep.subr.bf16.mxu1 %v3237_v8 }
 0x3b8   :  { %2711 = vmatmul.mubr.msk.bf16.vlgmr.msra.gmra.mrb[12].mxu0 %vm161_vm2, %v458_v16 }
 0x3b9   :  { %2722 = vmatprep.mubr.msk.bf16.mxu0 %vm3238_vm1, %v3237_v8 }
 0x3bc   :  { %2705 = vmatmul.mubr.msk.bf16.vlgmr.msra.gmra.mrb[8].mxu1 %vm161_vm2, %v406_v12 }
 0x3bd   :  { %2716 = vmatprep.mubr.msk.bf16.mxu1 %vm3238_vm1, %v3237_v8 }
 0x483   :  { %v3420_v17 = vpop.f32.mrb[8].mxu0 }
 0x484   :  { %v2700_v21 = vpop.f32.mrb[9].mxu0 }
 0x485   :  { %v3422_v22 = vpop.f32.mrb[10].mxu0 }
 0x486   :  { %v2701_v23 = vpop.f32.mrb[11].mxu0 }
 0x487   :  { %v3424_v24 = vpop.f32.mrb[4].mxu1 }
 0x488   :  { %v2694_v25 = vpop.f32.mrb[5].mxu1 }
 0x489   :  { %v3426_v26 = vpop.f32.mrb[6].mxu1 }
 0x48a   :  { %v2695_v27 = vpop.f32.mrb[7].mxu1 }
 0x48b   :  { %v501_v28 = vpop.f32.mrb[12].mxu0 }
 0x48c   :  { %v2712_v29 = vpop.f32.mrb[13].mxu0  ;;  %v514_v38 = vsel %vm259_vm3, %v501_v28, -inf }
 0x48d   :  { %v504_v30 = vpop.f32.mrb[14].mxu0 }
 0x48e   :  { %v2713_v31 = vpop.f32.mrb[15].mxu0  ;;  %v517_v39 = vsel %vm259_vm3, %v504_v30, -inf }
 0x48f   :  { %v449_v32 = vpop.f32.mrb[8].mxu1 }
 0x490   :  { %v2706_v33 = vpop.f32.mrb[9].mxu1  ;;  %v508_v34 = vsel %vm259_vm3, %v449_v32, -inf }
 0x491   :  { %509 = vmax.xlane.f32.xlu0 %v508_v34  ;;  %v452_v35 = vpop.f32.mrb[10].mxu1 }
 0x492   :  { %v2707_v36 = vpop.f32.mrb[11].mxu1  ;;  %v511_v37 = vsel %vm259_vm3, %v452_v35, -inf }
 0x493   :  { %512 = vmax.xlane.f32.xlu1 %v511_v37 }
 0x495   :  { %515 = vmax.xlane.f32.xlu0 %v514_v38 }
 0x499   :  { %518 = vmax.xlane.f32.xlu0 %v517_v39 }
 0x4a4   :  { %558 = vrot.lane.b32.xlu1 %v3366_v18, %s3242_s24 }
 0x51e   :  { %v510_v40 = vpop.xlane.xlu0 %509 }
 0x51f   :  { %v520_v42 = vsub.f32 %v449_v32, %v510_v40 }
 0x520   :  { %v513_v41 = vpop.xlane.xlu1 %512 }
 0x521   :  { %v524_v46 = vmul.f32 1.442695, %v520_v42  ;;  %v521_v47 = vsub.f32 %v452_v35, %v513_v41 }
 0x522   :  { %v516_v43 = vpop.xlane.xlu0 %515 }
 0x523   :  { %v522_v44 = vsub.f32 %v501_v28, %v516_v43  ;;  %v526_v51 = vmul.f32 1.442695, %v521_v47 }
 0x524   :  { %v559_v45 = vpop.permute.xlu1 %558 }
 0x525   :  { %v528_v48 = vmul.f32 1.442695, %v522_v44  ;;  %2715 = vmatpush3.bf16.msra.mxu1 %v559_v45 }
 0x526   :  { %v519_v49 = vpop.xlane.xlu0 %518  ;;  %2726 = vmatprep.subr.bf16.mxu1 %v3237_v8 }
 0x527   :  { %3016 = vpow2.f32 %v528_v48  ;;  %v523_v50 = vsub.f32 %v504_v30, %v519_v49 }
 0x528   :  { %3018 = vpow2.f32 %v524_v46 }
 0x529   :  { %v530_v52 = vmul.f32 1.442695, %v523_v50 }
 0x52b   :  { %3020 = vpow2.f32 %v530_v52 }
 0x52c   :  { %3022 = vpow2.f32 %v526_v51 }
 0x531   :  { %v3017_v53 = vpop.eup %3016 }
 0x532   :  { %v538_v54 = vsel %vm259_vm3, %v3017_v53, 0.0  ;;  %v3019_v55 = vpop.eup %3018 }
 0x533   :  { %539 = vadd.xlane.f32.xlu1 %v538_v54  ;;  %v532_v58 = vsel %vm259_vm3, %v3019_v55, 0.0 }
 0x535   :  { %v3021_v56 = vpop.eup %3020 }
 0x536   :  { %v541_v57 = vsel %vm259_vm3, %v3021_v56, 0.0  ;;  %v3023_v59 = vpop.eup %3022 }
 0x537   :  { %542 = vadd.xlane.f32.xlu0 %v541_v57  ;;  %533 = vadd.xlane.f32.xlu1 %v532_v58  ;;  %v535_v60 = vsel %vm259_vm3, %v3023_v59, 0.0 }
 0x53b   :  { %536 = vadd.xlane.f32.xlu0 %v535_v60 }
 0x548   :  { %654 = vrot.lane.b32.xlu1 %v3366_v18, %s3243_s25 }
 0x54c   :  { %705 = vrot.lane.b32.xlu1 %v3364_v14, %s3243_s25 }
 0x550   :  { %703 = vrot.lane.b32.xlu1 %v3368_v19, %s3244_s26 }
 0x551   :  { %605 = vrot.lane.b32.xlu0 %v3364_v14, %s3242_s24 }
 0x555   :  { %652 = vrot.lane.b32.xlu0 %v3370_v20, %s3244_s26 }
 0x5c0   :  { %v540_v61 = vpop.xlane.xlu1 %539 }
 0x5c1   :  { %3024 = vrcp.f32 %v540_v61 }
 0x5c4   :  { %v543_v62 = vpop.xlane.xlu0 %542  ;;  %v534_v63 = vpop.xlane.xlu1 %533 }
 0x5c5   :  { %3026 = vrcp.f32 %v543_v62 }
 0x5c6   :  { %3028 = vrcp.f32 %v534_v63 }
 0x5c8   :  { %v537_v0 = vpop.xlane.xlu0 %536  ;;  %v655_v1 = vpop.permute.xlu1 %654 }
 0x5c9   :  { %3030 = vrcp.f32 %v537_v0  ;;  %v660_v21 = vsel %vm161_vm2, %v655_v1, 0 }
 0x5cb   :  { %v3025_v3 = vpop.eup %3024 }
 0x5cc   :  { %v606_v2 = vpop.permute.xlu0 %605  ;;  %v554_v5 = vmul.f32 %v3025_v3, %v3017_v53  ;;  %v706_v9 = vpop.permute.xlu1 %705 }
 0x5cd   :  { %2721 = vmatpush3.bf16.msra.mxu0 %v606_v2  ;;  %v711_v15 = vsel %vm161_vm2, %v706_v9, 0 }
 0x5ce   :  { %2732 = vmatprep.subr.bf16.mxu0 %v3237_v8 }
 0x5cf   :  { %v3027_v4 = vpop.eup %3026 }
 0x5d0   :  { %v555_v6 = vmul.f32 %v3027_v4, %v3021_v56  ;;  %v3029_v7 = vpop.eup %3028  ;;  %v704_v23 = vpop.permute.xlu1 %703 }
 0x5d1   :  { %v552_v12 = vmul.f32 %v3029_v7, %v3019_v55  ;;  %v653_v25 = vpop.permute.xlu0 %652 }
 0x5d2   :  { %v557_v10 = vpack.c.bf16 %v555_v6, %v554_v5 }
 0x5d3   :  { %v3031_v11 = vpop.eup %3030 }
 0x5d4   :  { %v553_v13 = vmul.f32 %v3031_v11, %v3023_v59  ;;  %2723 = vmatmul.mubr.msk.bf16.vlgmr.msra.gmra.mrb[16].mxu0 %vm259_vm3, %v557_v10 }
 0x5d5   :  { %2734 = vmatprep.mubr.msk.bf16.mxu0 %vm3238_vm1, %v3237_v8 }
 0x5d6   :  { %2733 = vmatpush3.bf16.xpose.msra.mxu0 %v711_v15  ;;  %v556_v16 = vpack.c.bf16 %v553_v13, %v552_v12 }
 0x5d7   :  { %2744 = vmatprep.subr.bf16.mxu0 %v3237_v8 }
 0x5d8   :  { %2717 = vmatmul.mubr.msk.bf16.vlgmr.msra.gmra.mrb[12].mxu1 %vm259_vm3, %v556_v16 }
 0x5d9   :  { %2727 = vmatpush3.bf16.xpose.msra.mxu1 %v660_v21  ;;  %2728 = vmatprep.mubr.msk.bf16.mxu1 %vm3238_vm1, %v3237_v8 }
 0x5da   :  { %2738 = vmatprep.subr.bf16.mxu1 %v3237_v8 }
 0x5dd   :  { %2735 = vmatmul.mubr.msk.bf16.vlgmr.msra.gmra.mrb[20].mxu0 %vm161_vm2, %v704_v23 }
 0x5de   :  { %2746 = vmatprep.mubr.msk.bf16.mxu0 %vm3238_vm1, %v3237_v8 }
 0x5e0   :  { %2729 = vmatmul.mubr.msk.bf16.vlgmr.msra.gmra.mrb[16].mxu1 %vm161_vm2, %v653_v25 }
 0x5e1   :  { %2740 = vmatprep.mubr.msk.bf16.mxu1 %vm3238_vm1, %v3237_v8 }
 0x6a7   :  { %v3462_v27 = vpop.f32.mrb[16].mxu0 }
 0x6a8   :  { %v2724_v28 = vpop.f32.mrb[17].mxu0 }
 0x6a9   :  { %v3464_v29 = vpop.f32.mrb[18].mxu0 }
 0x6aa   :  { %v2929_v30 = vpack.i.bf16 %v3464_v29, %v3462_v27  ;;  %v2725_v31 = vpop.f32.mrb[19].mxu0 }
 0x6ab   :  { %v3468_v32 = vpop.f32.mrb[12].mxu1 }
 0x6ac   :  { %v2718_v33 = vpop.f32.mrb[13].mxu1 }
 0x6ad   :  { %v3470_v34 = vpop.f32.mrb[14].mxu1 }
 0x6ae   :  { %v2924_v35 = vpack.i.bf16 %v3470_v34, %v3468_v32  ;;  %v2719_v36 = vpop.f32.mrb[15].mxu1 }
 0x6b0   :  { %v747_v37 = vpop.f32.mrb[20].mxu0 }
 0x6b1   :  { %v2736_v38 = vpop.f32.mrb[21].mxu0  ;;  %v760_v47 = vsel %vm259_vm3, %v747_v37, -inf }
 0x6b2   :  { %v750_v39 = vpop.f32.mrb[22].mxu0 }
 0x6b3   :  { %v696_v40 = vpop.f32.mrb[16].mxu1  ;;  %v2737_v41 = vpop.f32.mrb[23].mxu0  ;;  %v763_v48 = vsel %vm259_vm3, %v750_v39, -inf }
 0x6b4   :  { %v2730_v42 = vpop.f32.mrb[17].mxu1  ;;  %v754_v43 = vsel %vm259_vm3, %v696_v40, -inf }
 0x6b5   :  { %755 = vmax.xlane.f32.xlu0 %v754_v43  ;;  %v699_v44 = vpop.f32.mrb[18].mxu1 }
 0x6b6   :  { %v2731_v45 = vpop.f32.mrb[19].mxu1  ;;  %v757_v46 = vsel %vm259_vm3, %v699_v44, -inf }
 0x6b7   :  { %758 = vmax.xlane.f32.xlu1 %v757_v46 }
 0x6b9   :  { %761 = vmax.xlane.f32.xlu0 %v760_v47 }
 0x6bd   :  { %764 = vmax.xlane.f32.xlu0 %v763_v48 }
 0x6c8   :  { %804 = vrot.lane.b32.xlu1 %v3366_v18, %s3245_s27 }
 0x742   :  { %v756_v49 = vpop.xlane.xlu0 %755 }
 0x743   :  { %v766_v51 = vsub.f32 %v696_v40, %v756_v49 }
 0x744   :  { %v759_v50 = vpop.xlane.xlu1 %758 }
 0x745   :  { %v770_v55 = vmul.f32 1.442695, %v766_v51  ;;  %v767_v56 = vsub.f32 %v699_v44, %v759_v50 }
 0x746   :  { %v762_v52 = vpop.xlane.xlu0 %761 }
 0x747   :  { %v768_v53 = vsub.f32 %v747_v37, %v762_v52  ;;  %v772_v60 = vmul.f32 1.442695, %v767_v56 }
 0x748   :  { %v805_v54 = vpop.permute.xlu1 %804 }
 0x749   :  { %v774_v57 = vmul.f32 1.442695, %v768_v53  ;;  %2739 = vmatpush3.bf16.msra.mxu1 %v805_v54 }
 0x74a   :  { %v765_v58 = vpop.xlane.xlu0 %764  ;;  %2750 = vmatprep.subr.bf16.mxu1 %v3237_v8 }
 0x74b   :  { %3032 = vpow2.f32 %v774_v57  ;;  %v769_v59 = vsub.f32 %v750_v39, %v765_v58 }
 0x74c   :  { %3034 = vpow2.f32 %v770_v55 }
 0x74d   :  { %v776_v61 = vmul.f32 1.442695, %v769_v59 }
 0x74f   :  { %3036 = vpow2.f32 %v776_v61 }
 0x750   :  { %3038 = vpow2.f32 %v772_v60 }
 0x755   :  { %v3033_v62 = vpop.eup %3032 }
 0x756   :  { %v784_v63 = vsel %vm259_vm3, %v3033_v62, 0.0  ;;  %v3035_v0 = vpop.eup %3034 }
 0x757   :  { %785 = vadd.xlane.f32.xlu1 %v784_v63  ;;  %v778_v3 = vsel %vm259_vm3, %v3035_v0, 0.0 }
 0x759   :  { %v3037_v1 = vpop.eup %3036 }
 0x75a   :  { %v787_v2 = vsel %vm259_vm3, %v3037_v1, 0.0  ;;  %v3039_v4 = vpop.eup %3038 }
 0x75b   :  { %788 = vadd.xlane.f32.xlu0 %v787_v2  ;;  %779 = vadd.xlane.f32.xlu1 %v778_v3  ;;  %v781_v5 = vsel %vm259_vm3, %v3039_v4, 0.0 }
 0x75f   :  { %782 = vadd.xlane.f32.xlu0 %v781_v5 }
 0x76c   :  { %900 = vrot.lane.b32.xlu1 %v3366_v18, %s3246_s29 }
 0x770   :  { %951 = vrot.lane.b32.xlu1 %v3364_v14, %s3246_s29 }
 0x774   :  { %949 = vrot.lane.b32.xlu1 %v3368_v19, %s3247_s1 }
 0x775   :  { %851 = vrot.lane.b32.xlu0 %v3364_v14, %s3245_s27 }
 0x779   :  { %898 = vrot.lane.b32.xlu0 %v3370_v20, %s3247_s1 }
 0x7e4   :  { %v786_v6 = vpop.xlane.xlu1 %785 }
 0x7e5   :  { %3040 = vrcp.f32 %v786_v6 }
 0x7e8   :  { %v789_v7 = vpop.xlane.xlu0 %788  ;;  %v780_v9 = vpop.xlane.xlu1 %779 }
 0x7e9   :  { %3042 = vrcp.f32 %v789_v7 }
 0x7ea   :  { %3044 = vrcp.f32 %v780_v9 }
 0x7ec   :  { %v783_v10 = vpop.xlane.xlu0 %782  ;;  %v901_v11 = vpop.permute.xlu1 %900 }
 0x7ed   :  { %3046 = vrcp.f32 %v783_v10  ;;  %v906_v39 = vsel %vm161_vm2, %v901_v11, 0 }
 0x7ef   :  { %v3041_v13 = vpop.eup %3040 }
 0x7f0   :  { %v852_v12 = vpop.permute.xlu0 %851  ;;  %v800_v16 = vmul.f32 %v3041_v13, %v3033_v62  ;;  %v952_v25 = vpop.permute.xlu1 %951 }
 0x7f1   :  { %2745 = vmatpush3.bf16.msra.mxu0 %v852_v12  ;;  %v957_v37 = vsel %vm161_vm2, %v952_v25, 0 }
 0x7f2   :  { %2756 = vmatprep.subr.bf16.mxu0 %v3237_v8 }
 0x7f3   :  { %v3043_v15 = vpop.eup %3042 }
 0x7f4   :  { %v801_v21 = vmul.f32 %v3043_v15, %v3037_v1  ;;  %v3045_v23 = vpop.eup %3044  ;;  %v950_v40 = vpop.permute.xlu1 %949 }
 0x7f5   :  { %v798_v33 = vmul.f32 %v3045_v23, %v3035_v0  ;;  %v899_v41 = vpop.permute.xlu0 %898 }
 0x7f6   :  { %v803_v28 = vpack.c.bf16 %v801_v21, %v800_v16 }
 0x7f7   :  { %v3047_v31 = vpop.eup %3046 }
 0x7f8   :  { %v799_v36 = vmul.f32 %v3047_v31, %v3039_v4  ;;  %2747 = vmatmul.mubr.msk.bf16.vlgmr.msra.gmra.mrb[24].mxu0 %vm259_vm3, %v803_v28 }
 0x7f9   :  { %2758 = vmatprep.mubr.msk.bf16.mxu0 %vm3238_vm1, %v3237_v8 }
 0x7fa   :  { %2757 = vmatpush3.bf16.xpose.msra.mxu0 %v957_v37  ;;  %v802_v38 = vpack.c.bf16 %v799_v36, %v798_v33 }
 0x7fb   :  { %2768 = vmatprep.subr.bf16.mxu0 %v3237_v8 }
 0x7fc   :  { %2741 = vmatmul.mubr.msk.bf16.vlgmr.msra.gmra.mrb[20].mxu1 %vm259_vm3, %v802_v38 }
 0x7fd   :  { %2751 = vmatpush3.bf16.xpose.msra.mxu1 %v906_v39  ;;  %2752 = vmatprep.mubr.msk.bf16.mxu1 %vm3238_vm1, %v3237_v8 }
 0x7fe   :  { %2762 = vmatprep.subr.bf16.mxu1 %v3237_v8 }
 0x801   :  { %2759 = vmatmul.mubr.msk.bf16.vlgmr.msra.gmra.mrb[28].mxu0 %vm161_vm2, %v950_v40 }
 0x802   :  { %2770 = vmatprep.mubr.msk.bf16.mxu0 %vm3238_vm1, %v3237_v8 }
 0x804   :  { %2753 = vmatmul.mubr.msk.bf16.vlgmr.msra.gmra.mrb[24].mxu1 %vm161_vm2, %v899_v41 }
 0x805   :  { %2764 = vmatprep.mubr.msk.bf16.mxu1 %vm3238_vm1, %v3237_v8 }
 0x8cb   :  { %v3508_v42 = vpop.f32.mrb[24].mxu0 }
 0x8cc   :  { %v2748_v43 = vpop.f32.mrb[25].mxu0 }
 0x8cd   :  { %v3510_v44 = vpop.f32.mrb[26].mxu0 }
 0x8ce   :  { %v2939_v45 = vpack.i.bf16 %v3510_v44, %v3508_v42  ;;  %v2749_v46 = vpop.f32.mrb[27].mxu0 }
 0x8cf   :  { %v3514_v47 = vpop.f32.mrb[20].mxu1 }
 0x8d0   :  { %v2742_v48 = vpop.f32.mrb[21].mxu1 }
 0x8d1   :  { %v3516_v49 = vpop.f32.mrb[22].mxu1 }
 0x8d2   :  { %v2934_v50 = vpack.i.bf16 %v3516_v49, %v3514_v47  ;;  %v2743_v51 = vpop.f32.mrb[23].mxu1 }
 0x8d4   :  { %v993_v52 = vpop.f32.mrb[28].mxu0 }
 0x8d5   :  { %v2760_v53 = vpop.f32.mrb[29].mxu0  ;;  %v1006_v62 = vsel %vm259_vm3, %v993_v52, -inf }
 0x8d6   :  { %v996_v54 = vpop.f32.mrb[30].mxu0 }
 0x8d7   :  { %v942_v55 = vpop.f32.mrb[24].mxu1  ;;  %v2761_v56 = vpop.f32.mrb[31].mxu0  ;;  %v1009_v63 = vsel %vm259_vm3, %v996_v54, -inf }
 0x8d8   :  { %v2754_v57 = vpop.f32.mrb[25].mxu1  ;;  %v1000_v58 = vsel %vm259_vm3, %v942_v55, -inf }
 0x8d9   :  { %1001 = vmax.xlane.f32.xlu0 %v1000_v58  ;;  %v945_v59 = vpop.f32.mrb[26].mxu1 }
 0x8da   :  { %v2755_v60 = vpop.f32.mrb[27].mxu1  ;;  %v1003_v61 = vsel %vm259_vm3, %v945_v59, -inf }
 0x8db   :  { %1004 = vmax.xlane.f32.xlu1 %v1003_v61 }
 0x8dd   :  { %1007 = vmax.xlane.f32.xlu0 %v1006_v62 }
 0x8e1   :  { %1010 = vmax.xlane.f32.xlu0 %v1009_v63 }
 0x8ec   :  { %1050 = vrot.lane.b32.xlu1 %v3366_v18, %s3248_s30 }
 0x966   :  { %v1002_v0 = vpop.xlane.xlu0 %1001 }
 0x967   :  { %v1012_v2 = vsub.f32 %v942_v55, %v1002_v0 }
 0x968   :  { %v1005_v1 = vpop.xlane.xlu1 %1004 }
 0x969   :  { %v1016_v6 = vmul.f32 1.442695, %v1012_v2  ;;  %v1013_v7 = vsub.f32 %v945_v59, %v1005_v1 }
 0x96a   :  { %v1008_v3 = vpop.xlane.xlu0 %1007 }
 0x96b   :  { %v1014_v4 = vsub.f32 %v993_v52, %v1008_v3  ;;  %v1018_v12 = vmul.f32 1.442695, %v1013_v7 }
 0x96c   :  { %v1051_v5 = vpop.permute.xlu1 %1050 }
 0x96d   :  { %v1020_v9 = vmul.f32 1.442695, %v1014_v4  ;;  %2763 = vmatpush3.bf16.msra.mxu1 %v1051_v5 }
 0x96e   :  { %v1011_v10 = vpop.xlane.xlu0 %1010  ;;  %2774 = vmatprep.subr.bf16.mxu1 %v3237_v8 }
 0x96f   :  { %3048 = vpow2.f32 %v1020_v9  ;;  %v1015_v11 = vsub.f32 %v996_v54, %v1011_v10 }
 0x970   :  { %3050 = vpow2.f32 %v1016_v6 }
 0x971   :  { %v1022_v13 = vmul.f32 1.442695, %v1015_v11 }
 0x973   :  { %3052 = vpow2.f32 %v1022_v13 }
 0x974   :  { %3054 = vpow2.f32 %v1018_v12 }
 0x979   :  { %v3049_v15 = vpop.eup %3048 }
 0x97a   :  { %v1030_v16 = vsel %vm259_vm3, %v3049_v15, 0.0  ;;  %v3051_v21 = vpop.eup %3050 }
 0x97b   :  { %1031 = vadd.xlane.f32.xlu1 %v1030_v16  ;;  %v1024_v28 = vsel %vm259_vm3, %v3051_v21, 0.0 }
 0x97d   :  { %v3053_v23 = vpop.eup %3052 }
 0x97e   :  { %v1033_v25 = vsel %vm259_vm3, %v3053_v23, 0.0  ;;  %v3055_v31 = vpop.eup %3054 }
 0x97f   :  { %1034 = vadd.xlane.f32.xlu0 %v1033_v25  ;;  %1025 = vadd.xlane.f32.xlu1 %v1024_v28  ;;  %v1027_v33 = vsel %vm259_vm3, %v3055_v31, 0.0 }
 0x983   :  { %1028 = vadd.xlane.f32.xlu0 %v1027_v33 }
 0x990   :  { %1146 = vrot.lane.b32.xlu1 %v3366_v18, %s3249_s9 }
 0x994   :  { %1197 = vrot.lane.b32.xlu1 %v3364_v14, %s3249_s9  ;;  %s3266_s9 = smov 32  }
 0x998   :  { %1195 = vrot.lane.b32.xlu1 %v3368_v19, %s3250_s10 }
 0x999   :  { %1097 = vrot.lane.b32.xlu0 %v3364_v14, %s3248_s30 }
 0x99d   :  { %1144 = vrot.lane.b32.xlu0 %v3370_v20, %s3250_s10  ;;  %s3267_s10 = smov [#allocation8]  }
 0xa08   :  { %v1032_v36 = vpop.xlane.xlu1 %1031 }
 0xa09   :  { %3056 = vrcp.f32 %v1032_v36 }
 0xa0c   :  { %v1035_v37 = vpop.xlane.xlu0 %1034  ;;  %v1026_v38 = vpop.xlane.xlu1 %1025 }
 0xa0d   :  { %3058 = vrcp.f32 %v1035_v37 }
 0xa0e   :  { %3060 = vrcp.f32 %v1026_v38 }
 0xa10   :  { %v1029_v39 = vpop.xlane.xlu0 %1028  ;;  %v1147_v40 = vpop.permute.xlu1 %1146 }
 0xa11   :  { %3062 = vrcp.f32 %v1029_v39  ;;  %v1152_v60 = vsel %vm161_vm2, %v1147_v40, 0 }
 0xa13   :  { %v3057_v43 = vpop.eup %3056 }
 0xa14   :  { %v1098_v41 = vpop.permute.xlu0 %1097  ;;  %v1046_v48 = vmul.f32 %v3057_v43, %v3049_v15  ;;  %v1198_v53 = vpop.permute.xlu1 %1197 }
 0xa15   :  { %2769 = vmatpush3.bf16.msra.mxu0 %v1098_v41  ;;  %v1203_v58 = vsel %vm161_vm2, %v1198_v53, 0 }
 0xa16   :  { %2780 = vmatprep.subr.bf16.mxu0 %v3237_v8 }
 0xa17   :  { %v3059_v46 = vpop.eup %3058 }
 0xa18   :  { %v1047_v51 = vmul.f32 %v3059_v46, %v3053_v23  ;;  %v3061_v52 = vpop.eup %3060  ;;  %v1196_v61 = vpop.permute.xlu1 %1195 }
 0xa19   :  { %v1044_v56 = vmul.f32 %v3061_v52, %v3051_v21  ;;  %v1145_v62 = vpop.permute.xlu0 %1144 }
 0xa1a   :  { %v1049_v54 = vpack.c.bf16 %v1047_v51, %v1046_v48 }
 0xa1b   :  { %v3063_v55 = vpop.eup %3062 }
 0xa1c   :  { %v1045_v57 = vmul.f32 %v3063_v55, %v3055_v31  ;;  %2771 = vmatmul.mubr.msk.bf16.vlgmr.msra.gmra.mrb[32].mxu0 %vm259_vm3, %v1049_v54 }
 0xa1d   :  { %2782 = vmatprep.mubr.msk.bf16.mxu0 %vm3238_vm1, %v3237_v8 }
 0xa1e   :  { %2781 = vmatpush3.bf16.xpose.msra.mxu0 %v1203_v58  ;;  %v1048_v59 = vpack.c.bf16 %v1045_v57, %v1044_v56 }
 0xa1f   :  { %2792 = vmatprep.subr.bf16.mxu0 %v3237_v8 }
 0xa20   :  { %2765 = vmatmul.mubr.msk.bf16.vlgmr.msra.gmra.mrb[28].mxu1 %vm259_vm3, %v1048_v59 }
 0xa21   :  { %2775 = vmatpush3.bf16.xpose.msra.mxu1 %v1152_v60  ;;  %2776 = vmatprep.mubr.msk.bf16.mxu1 %vm3238_vm1, %v3237_v8 }
 0xa22   :  { %2786 = vmatprep.subr.bf16.mxu1 %v3237_v8 }
 0xa25   :  { %2783 = vmatmul.mubr.msk.bf16.vlgmr.msra.gmra.mrb[36].mxu0 %vm161_vm2, %v1196_v61 }
 0xa26   :  { %2794 = vmatprep.mubr.msk.bf16.mxu0 %vm3238_vm1, %v3237_v8 }
 0xa28   :  { %2777 = vmatmul.mubr.msk.bf16.vlgmr.msra.gmra.mrb[32].mxu1 %vm161_vm2, %v1145_v62 }
 0xa29   :  { %2788 = vmatprep.mubr.msk.bf16.mxu1 %vm3238_vm1, %v3237_v8 }
 0xaef   :  { %v3554_v63 = vpop.f32.mrb[32].mxu0 }
 0xaf0   :  { %v2772_v0 = vpop.f32.mrb[33].mxu0 }
 0xaf1   :  { %v3556_v1 = vpop.f32.mrb[34].mxu0 }
 0xaf2   :  { %v2949_v2 = vpack.i.bf16 %v3556_v1, %v3554_v63  ;;  %v2773_v3 = vpop.f32.mrb[35].mxu0 }
 0xaf3   :  { %v3560_v4 = vpop.f32.mrb[28].mxu1 }
 0xaf4   :  { %v2766_v5 = vpop.f32.mrb[29].mxu1 }
 0xaf5   :  { %v3562_v6 = vpop.f32.mrb[30].mxu1 }
 0xaf6   :  { %v2944_v7 = vpack.i.bf16 %v3562_v6, %v3560_v4  ;;  %v2767_v9 = vpop.f32.mrb[31].mxu1  ;;  %v2997_v4 = vld [vmem:[#allocation7 + $0x8] sm:$0xff]  }
 0xaf8   :  { %v1239_v10 = vpop.f32.mrb[36].mxu0 }
 0xaf9   :  { %v2784_v11 = vpop.f32.mrb[37].mxu0  ;;  %v1252_v31 = vsel %vm259_vm3, %v1239_v10, -inf }
 0xafa   :  { %v1242_v12 = vpop.f32.mrb[38].mxu0 }
 0xafb   :  { %v1188_v13 = vpop.f32.mrb[32].mxu1  ;;  %v2785_v15 = vpop.f32.mrb[39].mxu0  ;;  %v1255_v33 = vsel %vm259_vm3, %v1242_v12, -inf }
 0xafc   :  { %v2778_v16 = vpop.f32.mrb[33].mxu1  ;;  %v1246_v21 = vsel %vm259_vm3, %v1188_v13, -inf }
 0xafd   :  { %1247 = vmax.xlane.f32.xlu0 %v1246_v21  ;;  %v1191_v23 = vpop.f32.mrb[34].mxu1 }
 0xafe   :  { %v2779_v25 = vpop.f32.mrb[35].mxu1  ;;  %v1249_v28 = vsel %vm259_vm3, %v1191_v23, -inf }
 0xaff   :  { %1250 = vmax.xlane.f32.xlu1 %v1249_v28 }
 0xb01   :  { %1253 = vmax.xlane.f32.xlu0 %v1252_v31 }
 0xb05   :  { %1256 = vmax.xlane.f32.xlu0 %v1255_v33 }
 0xb10   :  { %1296 = vrot.lane.b32.xlu1 %v3366_v18, %s3251_s11 }
 0xb8a   :  { %v1248_v36 = vpop.xlane.xlu0 %1247 }
 0xb8b   :  { %v1258_v38 = vsub.f32 %v1188_v13, %v1248_v36 }
 0xb8c   :  { %v1251_v37 = vpop.xlane.xlu1 %1250 }
 0xb8d   :  { %v1262_v43 = vmul.f32 1.442695, %v1258_v38  ;;  %v1259_v46 = vsub.f32 %v1191_v23, %v1251_v37 }
 0xb8e   :  { %v1254_v39 = vpop.xlane.xlu0 %1253 }
 0xb8f   :  { %v1260_v40 = vsub.f32 %v1239_v10, %v1254_v39  ;;  %v1264_v53 = vmul.f32 1.442695, %v1259_v46 }
 0xb90   :  { %v1297_v41 = vpop.permute.xlu1 %1296 }
 0xb91   :  { %v1266_v48 = vmul.f32 1.442695, %v1260_v40  ;;  %2787 = vmatpush3.bf16.msra.mxu1 %v1297_v41 }
 0xb92   :  { %v1257_v51 = vpop.xlane.xlu0 %1256  ;;  %2798 = vmatprep.subr.bf16.mxu1 %v3237_v8 }
 0xb93   :  { %3064 = vpow2.f32 %v1266_v48  ;;  %v1261_v52 = vsub.f32 %v1242_v12, %v1257_v51 }
 0xb94   :  { %3066 = vpow2.f32 %v1262_v43 }
 0xb95   :  { %v1268_v54 = vmul.f32 1.442695, %v1261_v52 }
 0xb97   :  { %3068 = vpow2.f32 %v1268_v54 }
 0xb98   :  { %3070 = vpow2.f32 %v1264_v53 }
 0xb9d   :  { %v3065_v55 = vpop.eup %3064 }
 0xb9e   :  { %v1276_v56 = vsel %vm259_vm3, %v3065_v55, 0.0  ;;  %v3067_v57 = vpop.eup %3066 }
 0xb9f   :  { %1277 = vadd.xlane.f32.xlu1 %v1276_v56  ;;  %v1270_v60 = vsel %vm259_vm3, %v3067_v57, 0.0 }
 0xba1   :  { %v3069_v58 = vpop.eup %3068 }
 0xba2   :  { %v1279_v59 = vsel %vm259_vm3, %v3069_v58, 0.0  ;;  %v3071_v61 = vpop.eup %3070 }
 0xba3   :  { %1280 = vadd.xlane.f32.xlu0 %v1279_v59  ;;  %1271 = vadd.xlane.f32.xlu1 %v1270_v60  ;;  %v1273_v62 = vsel %vm259_vm3, %v3071_v61, 0.0 }
 0xba7   :  { %1274 = vadd.xlane.f32.xlu0 %v1273_v62 }
 0xbb4   :  { %1392 = vrot.lane.b32.xlu1 %v3366_v18, %s3252_s12 }
 0xbb8   :  { %1443 = vrot.lane.b32.xlu1 %v3364_v14, %s3252_s12 }
 0xbbc   :  { %1441 = vrot.lane.b32.xlu1 %v3368_v19, %s3253_s13 }
 0xbbd   :  { %1343 = vrot.lane.b32.xlu0 %v3364_v14, %s3251_s11  ;;  %s2538_s11 = sshll.u32 %s3267_s10, 4  ;;  %s2539_s11 = int_to_ptr.vmem [resolvable:$true] %s2538_s11 }
 0xbbe   :  { %s3202_s12 = scalar_lea.vmem %s2539_s11, 32  ;;  %p3207_p11 = scmp.lt.s32.totalorder %s2539_s11, %s2539_s11 }
 0xbbf   :  { %p3203_p10 = scmp.ne.s32.totalorder %s2539_s11, %s3202_s12  ;;  %p3208_p12 = scmp.lt.s32.totalorder %s3202_s12, %s3202_s12 }
 0xbc1   :  { %1390 = vrot.lane.b32.xlu0 %v3370_v20, %s3253_s13  ;;  %p3209_p13 = por %p3208_p12, %p3207_p11 }
 0xbc3   :  { %p3210_p0 = pnand %p3209_p13, %p3203_p10 }
 0xc2c   :  { %v1278_v0 = vpop.xlane.xlu1 %1277 }
 0xc2d   :  { %3072 = vrcp.f32 %v1278_v0 }
 0xc30   :  { %v1281_v3 = vpop.xlane.xlu0 %1280  ;;  %v1272_v5 = vpop.xlane.xlu1 %1271 }
 0xc31   :  { %3074 = vrcp.f32 %v1281_v3 }
 0xc32   :  { %3076 = vrcp.f32 %v1272_v5 }
 0xc34   :  { %v1275_v9 = vpop.xlane.xlu0 %1274  ;;  %v1393_v10 = vpop.permute.xlu1 %1392 }
 0xc35   :  { %3078 = vrcp.f32 %v1275_v9  ;;  %v1398_v38 = vsel %vm161_vm2, %v1393_v10, 0 }
 0xc37   :  { %v3073_v12 = vpop.eup %3072 }
 0xc38   :  { %v1344_v11 = vpop.permute.xlu0 %1343  ;;  %v1292_v15 = vmul.f32 %v3073_v12, %v3065_v55  ;;  %v1444_v23 = vpop.permute.xlu1 %1443 }
 0xc39   :  { %2793 = vmatpush3.bf16.msra.mxu0 %v1344_v11  ;;  %v1449_v36 = vsel %vm161_vm2, %v1444_v23, 0 }
 0xc3a   :  { %2804 = vmatprep.subr.bf16.mxu0 %v3237_v8 }
 0xc3b   :  { %v3075_v13 = vpop.eup %3074 }
 0xc3c   :  { %v1293_v16 = vmul.f32 %v3075_v13, %v3069_v58  ;;  %v3077_v21 = vpop.eup %3076  ;;  %v1442_v39 = vpop.permute.xlu1 %1441 }
 0xc3d   :  { %v1290_v31 = vmul.f32 %v3077_v21, %v3067_v57  ;;  %v1391_v40 = vpop.permute.xlu0 %1390 }
 0xc3e   :  { %v1295_v25 = vpack.c.bf16 %v1293_v16, %v1292_v15 }
 0xc3f   :  { %v3079_v28 = vpop.eup %3078 }
 0xc40   :  { %v1291_v33 = vmul.f32 %v3079_v28, %v3071_v61  ;;  %2795 = vmatmul.mubr.msk.bf16.vlgmr.msra.gmra.mrb[40].mxu0 %vm259_vm3, %v1295_v25 }
 0xc41   :  { %2806 = vmatprep.mubr.msk.bf16.mxu0 %vm3238_vm1, %v3237_v8 }
 0xc42   :  { %2805 = vmatpush3.bf16.xpose.msra.mxu0 %v1449_v36  ;;  %v1294_v37 = vpack.c.bf16 %v1291_v33, %v1290_v31 }
 0xc43   :  { %2816 = vmatprep.subr.bf16.mxu0 %v3237_v8 }
 0xc44   :  { %2789 = vmatmul.mubr.msk.bf16.vlgmr.msra.gmra.mrb[36].mxu1 %vm259_vm3, %v1294_v37 }
 0xc45   :  { %2799 = vmatpush3.bf16.xpose.msra.mxu1 %v1398_v38  ;;  %2800 = vmatprep.mubr.msk.bf16.mxu1 %vm3238_vm1, %v3237_v8 }
 0xc46   :  { %2810 = vmatprep.subr.bf16.mxu1 %v3237_v8 }
 0xc49   :  { %2807 = vmatmul.mubr.msk.bf16.vlgmr.msra.gmra.mrb[44].mxu0 %vm161_vm2, %v1442_v39 }
 0xc4a   :  { %2818 = vmatprep.mubr.msk.bf16.mxu0 %vm3238_vm1, %v3237_v8 }
 0xc4c   :  { %2801 = vmatmul.mubr.msk.bf16.vlgmr.msra.gmra.mrb[40].mxu1 %vm161_vm2, %v1391_v40 }
 0xc4d   :  { %2812 = vmatprep.mubr.msk.bf16.mxu1 %vm3238_vm1, %v3237_v8 }
 0xd13   :  { %v3600_v41 = vpop.f32.mrb[40].mxu0 }
 0xd14   :  { %v2796_v43 = vpop.f32.mrb[41].mxu0 }
 0xd15   :  { %v3602_v46 = vpop.f32.mrb[42].mxu0 }
 0xd16   :  { %v2959_v48 = vpack.i.bf16 %v3602_v46, %v3600_v41  ;;  %v2797_v51 = vpop.f32.mrb[43].mxu0 }
 0xd17   :  { %v3606_v52 = vpop.f32.mrb[36].mxu1 }
 0xd18   :  { %v2790_v53 = vpop.f32.mrb[37].mxu1 }
 0xd19   :  { %v3608_v54 = vpop.f32.mrb[38].mxu1 }
 0xd1a   :  { %v2954_v55 = vpack.i.bf16 %v3608_v54, %v3606_v52  ;;  %v2791_v56 = vpop.f32.mrb[39].mxu1 }
 0xd1c   :  { %v1485_v57 = vpop.f32.mrb[44].mxu0 }
 0xd1d   :  { %v2808_v58 = vpop.f32.mrb[45].mxu0  ;;  %v1498_v10 = vsel %vm259_vm3, %v1485_v57, -inf }
 0xd1e   :  { %v1488_v59 = vpop.f32.mrb[46].mxu0 }
 0xd1f   :  { %v1434_v60 = vpop.f32.mrb[40].mxu1  ;;  %v2809_v61 = vpop.f32.mrb[47].mxu0  ;;  %v1501_v11 = vsel %vm259_vm3, %v1488_v59, -inf }
 0xd20   :  { %v2802_v62 = vpop.f32.mrb[41].mxu1  ;;  %v1492_v0 = vsel %vm259_vm3, %v1434_v60, -inf }
 0xd21   :  { %1493 = vmax.xlane.f32.xlu0 %v1492_v0  ;;  %v1437_v3 = vpop.f32.mrb[42].mxu1 }
 0xd22   :  { %v2803_v5 = vpop.f32.mrb[43].mxu1  ;;  %v1495_v9 = vsel %vm259_vm3, %v1437_v3, -inf }
 0xd23   :  { %1496 = vmax.xlane.f32.xlu1 %v1495_v9 }
 0xd25   :  { %1499 = vmax.xlane.f32.xlu0 %v1498_v10 }
 0xd29   :  { %1502 = vmax.xlane.f32.xlu0 %v1501_v11 }
 0xd34   :  { %1542 = vrot.lane.b32.xlu1 %v3366_v18, %s3254_s14 }
 0xdae   :  { %v1494_v12 = vpop.xlane.xlu0 %1493 }
 0xdaf   :  { %v1504_v15 = vsub.f32 %v1434_v60, %v1494_v12 }
 0xdb0   :  { %v1497_v13 = vpop.xlane.xlu1 %1496 }
 0xdb1   :  { %v1508_v25 = vmul.f32 1.442695, %v1504_v15  ;;  %v1505_v28 = vsub.f32 %v1437_v3, %v1497_v13 }
 0xdb2   :  { %v1500_v16 = vpop.xlane.xlu0 %1499 }
 0xdb3   :  { %v1506_v21 = vsub.f32 %v1485_v57, %v1500_v16  ;;  %v1510_v37 = vmul.f32 1.442695, %v1505_v28 }
 0xdb4   :  { %v1543_v23 = vpop.permute.xlu1 %1542 }
 0xdb5   :  { %v1512_v31 = vmul.f32 1.442695, %v1506_v21  ;;  %2811 = vmatpush3.bf16.msra.mxu1 %v1543_v23 }
 0xdb6   :  { %v1503_v33 = vpop.xlane.xlu0 %1502  ;;  %2822 = vmatprep.subr.bf16.mxu1 %v3237_v8 }
 0xdb7   :  { %3080 = vpow2.f32 %v1512_v31  ;;  %v1507_v36 = vsub.f32 %v1488_v59, %v1503_v33 }
 0xdb8   :  { %3082 = vpow2.f32 %v1508_v25 }
 0xdb9   :  { %v1514_v38 = vmul.f32 1.442695, %v1507_v36 }
 0xdbb   :  { %3084 = vpow2.f32 %v1514_v38 }
 0xdbc   :  { %3086 = vpow2.f32 %v1510_v37 }
 0xdc1   :  { %v3081_v39 = vpop.eup %3080 }
 0xdc2   :  { %v1522_v40 = vsel %vm259_vm3, %v3081_v39, 0.0  ;;  %v3083_v43 = vpop.eup %3082 }
 0xdc3   :  { %1523 = vadd.xlane.f32.xlu1 %v1522_v40  ;;  %v1516_v56 = vsel %vm259_vm3, %v3083_v43, 0.0 }
 0xdc5   :  { %v3085_v51 = vpop.eup %3084 }
 0xdc6   :  { %v1525_v53 = vsel %vm259_vm3, %v3085_v51, 0.0  ;;  %v3087_v57 = vpop.eup %3086 }
 0xdc7   :  { %1526 = vadd.xlane.f32.xlu0 %v1525_v53  ;;  %1517 = vadd.xlane.f32.xlu1 %v1516_v56  ;;  %v1519_v58 = vsel %vm259_vm3, %v3087_v57, 0.0 }
 0xdcb   :  { %1520 = vadd.xlane.f32.xlu0 %v1519_v58 }
 0xdd8   :  { %1638 = vrot.lane.b32.xlu1 %v3366_v18, %s3255_s17 }
 0xddc   :  { %1689 = vrot.lane.b32.xlu1 %v3364_v14, %s3255_s17 }
 0xde0   :  { %1687 = vrot.lane.b32.xlu1 %v3368_v19, %s3256_s18 }
 0xde1   :  { %1589 = vrot.lane.b32.xlu0 %v3364_v14, %s3254_s14 }
 0xde5   :  { %1636 = vrot.lane.b32.xlu0 %v3370_v20, %s3256_s18 }
 0xe50   :  { %v1524_v59 = vpop.xlane.xlu1 %1523 }
 0xe51   :  { %3088 = vrcp.f32 %v1524_v59 }
 0xe54   :  { %v1527_v60 = vpop.xlane.xlu0 %1526  ;;  %v1518_v61 = vpop.xlane.xlu1 %1517 }
 0xe55   :  { %3090 = vrcp.f32 %v1527_v60 }
 0xe56   :  { %3092 = vrcp.f32 %v1518_v61 }
 0xe58   :  { %v1521_v62 = vpop.xlane.xlu0 %1520  ;;  %v1639_v0 = vpop.permute.xlu1 %1638 }
 0xe59   :  { %3094 = vrcp.f32 %v1521_v62  ;;  %v1644_v31 = vsel %vm161_vm2, %v1639_v0, 0 }
 0xe5b   :  { %v3089_v5 = vpop.eup %3088 }
 0xe5c   :  { %v1590_v3 = vpop.permute.xlu0 %1589  ;;  %v1538_v10 = vmul.f32 %v3089_v5, %v3081_v39  ;;  %v1690_v13 = vpop.permute.xlu1 %1689 }
 0xe5d   :  { %2817 = vmatpush3.bf16.msra.mxu0 %v1590_v3  ;;  %v1695_v25 = vsel %vm161_vm2, %v1690_v13, 0 }
 0xe5e   :  { %2828 = vmatprep.subr.bf16.mxu0 %v3237_v8 }
 0xe5f   :  { %v3091_v9 = vpop.eup %3090 }
 0xe60   :  { %v1539_v11 = vmul.f32 %v3091_v9, %v3085_v51  ;;  %v3093_v12 = vpop.eup %3092  ;;  %v1688_v33 = vpop.permute.xlu1 %1687 }
 0xe61   :  { %v1536_v21 = vmul.f32 %v3093_v12, %v3083_v43  ;;  %v1637_v36 = vpop.permute.xlu0 %1636 }
 0xe62   :  { %v1541_v15 = vpack.c.bf16 %v1539_v11, %v1538_v10 }
 0xe63   :  { %v3095_v16 = vpop.eup %3094 }
 0xe64   :  { %v1537_v23 = vmul.f32 %v3095_v16, %v3087_v57  ;;  %2819 = vmatmul.mubr.msk.bf16.vlgmr.msra.gmra.mrb[48].mxu0 %vm259_vm3, %v1541_v15 }
 0xe65   :  { %2830 = vmatprep.mubr.msk.bf16.mxu0 %vm3238_vm1, %v3237_v8 }
 0xe66   :  { %2829 = vmatpush3.bf16.xpose.msra.mxu0 %v1695_v25  ;;  %v1540_v28 = vpack.c.bf16 %v1537_v23, %v1536_v21 }
 0xe67   :  { %2840 = vmatprep.subr.bf16.mxu0 %v3237_v8 }
 0xe68   :  { %2813 = vmatmul.mubr.msk.bf16.vlgmr.msra.gmra.mrb[44].mxu1 %vm259_vm3, %v1540_v28 }
 0xe69   :  { %2823 = vmatpush3.bf16.xpose.msra.mxu1 %v1644_v31  ;;  %2824 = vmatprep.mubr.msk.bf16.mxu1 %vm3238_vm1, %v3237_v8 }
 0xe6a   :  { %2834 = vmatprep.subr.bf16.mxu1 %v3237_v8 }
 0xe6d   :  { %2831 = vmatmul.mubr.msk.bf16.vlgmr.msra.gmra.mrb[52].mxu0 %vm161_vm2, %v1688_v33 }
 0xe6e   :  { %2842 = vmatprep.mubr.msk.bf16.mxu0 %vm3238_vm1, %v3237_v8 }
 0xe70   :  { %2825 = vmatmul.mubr.msk.bf16.vlgmr.msra.gmra.mrb[48].mxu1 %vm161_vm2, %v1637_v36 }
 0xe71   :  { %2836 = vmatprep.mubr.msk.bf16.mxu1 %vm3238_vm1, %v3237_v8 }
 0xf37   :  { %v3646_v37 = vpop.f32.mrb[48].mxu0 }
 0xf38   :  { %v2820_v38 = vpop.f32.mrb[49].mxu0 }
 0xf39   :  { %v3648_v39 = vpop.f32.mrb[50].mxu0 }
 0xf3a   :  { %v2969_v40 = vpack.i.bf16 %v3648_v39, %v3646_v37  ;;  %v2821_v43 = vpop.f32.mrb[51].mxu0 }
 0xf3b   :  { %v3652_v51 = vpop.f32.mrb[44].mxu1 }
 0xf3c   :  { %v2814_v53 = vpop.f32.mrb[45].mxu1 }
 0xf3d   :  { %v3654_v56 = vpop.f32.mrb[46].mxu1 }
 0xf3e   :  { %v2964_v57 = vpack.i.bf16 %v3654_v56, %v3652_v51  ;;  %v2815_v58 = vpop.f32.mrb[47].mxu1 }
 0xf40   :  { %v1731_v59 = vpop.f32.mrb[52].mxu0 }
 0xf41   :  { %v2832_v60 = vpop.f32.mrb[53].mxu0  ;;  %v1744_v12 = vsel %vm259_vm3, %v1731_v59, -inf }
 0xf42   :  { %v1734_v61 = vpop.f32.mrb[54].mxu0 }
 0xf43   :  { %v1680_v62 = vpop.f32.mrb[48].mxu1  ;;  %v2833_v0 = vpop.f32.mrb[55].mxu0  ;;  %v1747_v13 = vsel %vm259_vm3, %v1734_v61, -inf }
 0xf44   :  { %v2826_v3 = vpop.f32.mrb[49].mxu1  ;;  %v1738_v5 = vsel %vm259_vm3, %v1680_v62, -inf }
 0xf45   :  { %1739 = vmax.xlane.f32.xlu0 %v1738_v5  ;;  %v1683_v9 = vpop.f32.mrb[50].mxu1 }
 0xf46   :  { %v2827_v10 = vpop.f32.mrb[51].mxu1  ;;  %v1741_v11 = vsel %vm259_vm3, %v1683_v9, -inf }
 0xf47   :  { %1742 = vmax.xlane.f32.xlu1 %v1741_v11 }
 0xf49   :  { %1745 = vmax.xlane.f32.xlu0 %v1744_v12 }
 0xf4d   :  { %1748 = vmax.xlane.f32.xlu0 %v1747_v13 }
 0xf58   :  { %1788 = vrot.lane.b32.xlu1 %v3366_v18, %s3257_s19 }
 0xfd2   :  { %v1740_v15 = vpop.xlane.xlu0 %1739 }
 0xfd3   :  { %v1750_v21 = vsub.f32 %v1680_v62, %v1740_v15 }
 0xfd4   :  { %v1743_v16 = vpop.xlane.xlu1 %1742 }
 0xfd5   :  { %v1754_v31 = vmul.f32 1.442695, %v1750_v21  ;;  %v1751_v33 = vsub.f32 %v1683_v9, %v1743_v16 }
 0xfd6   :  { %v1746_v23 = vpop.xlane.xlu0 %1745 }
 0xfd7   :  { %v1752_v25 = vsub.f32 %v1731_v59, %v1746_v23  ;;  %v1756_v53 = vmul.f32 1.442695, %v1751_v33 }
 0xfd8   :  { %v1789_v28 = vpop.permute.xlu1 %1788 }
 0xfd9   :  { %v1758_v36 = vmul.f32 1.442695, %v1752_v25  ;;  %2835 = vmatpush3.bf16.msra.mxu1 %v1789_v28 }
 0xfda   :  { %v1749_v38 = vpop.xlane.xlu0 %1748  ;;  %2846 = vmatprep.subr.bf16.mxu1 %v3237_v8 }
 0xfdb   :  { %3096 = vpow2.f32 %v1758_v36  ;;  %v1753_v43 = vsub.f32 %v1734_v61, %v1749_v38 }
 0xfdc   :  { %3098 = vpow2.f32 %v1754_v31 }
 0xfdd   :  { %v1760_v58 = vmul.f32 1.442695, %v1753_v43 }
 0xfdf   :  { %3100 = vpow2.f32 %v1760_v58 }
 0xfe0   :  { %3102 = vpow2.f32 %v1756_v53 }
 0xfe5   :  { %v3097_v60 = vpop.eup %3096 }
 0xfe6   :  { %v1768_v62 = vsel %vm259_vm3, %v3097_v60, 0.0  ;;  %v3099_v0 = vpop.eup %3098 }
 0xfe7   :  { %1769 = vadd.xlane.f32.xlu1 %v1768_v62  ;;  %v1762_v5 = vsel %vm259_vm3, %v3099_v0, 0.0 }
 0xfe9   :  { %v3101_v59 = vpop.eup %3100 }
 0xfea   :  { %v1771_v3 = vsel %vm259_vm3, %v3101_v59, 0.0  ;;  %v3103_v9 = vpop.eup %3102 }
 0xfeb   :  { %1772 = vadd.xlane.f32.xlu0 %v1771_v3  ;;  %1763 = vadd.xlane.f32.xlu1 %v1762_v5  ;;  %v1765_v61 = vsel %vm259_vm3, %v3103_v9, 0.0 }
 0xfef   :  { %1766 = vadd.xlane.f32.xlu0 %v1765_v61 }
 0xffc   :  { %1884 = vrot.lane.b32.xlu1 %v3366_v18, %s3258_s21 }
0x1000   :  { %1935 = vrot.lane.b32.xlu1 %v3364_v14, %s3258_s21 }
0x1004   :  { %1933 = vrot.lane.b32.xlu1 %v3368_v19, %s3259_s22 }
0x1005   :  { %1835 = vrot.lane.b32.xlu0 %v3364_v14, %s3257_s19 }
0x1009   :  { %1882 = vrot.lane.b32.xlu0 %v3370_v20, %s3259_s22 }
0x1074   :  { %v1770_v10 = vpop.xlane.xlu1 %1769 }
0x1075   :  { %3104 = vrcp.f32 %v1770_v10 }
0x1078   :  { %v1773_v11 = vpop.xlane.xlu0 %1772  ;;  %v1764_v12 = vpop.xlane.xlu1 %1763 }
0x1079   :  { %3106 = vrcp.f32 %v1773_v11 }
0x107a   :  { %3108 = vrcp.f32 %v1764_v12 }
0x107c   :  { %v1767_v13 = vpop.xlane.xlu0 %1766  ;;  %v1885_v15 = vpop.permute.xlu1 %1884 }
0x107d   :  { %3110 = vrcp.f32 %v1767_v13  ;;  %v1890_v58 = vsel %vm161_vm2, %v1885_v15, 0 }
0x107f   :  { %v3105_v21 = vpop.eup %3104 }
0x1080   :  { %v1836_v16 = vpop.permute.xlu0 %1835  ;;  %v1784_v23 = vmul.f32 %v3105_v21, %v3097_v60  ;;  %v1936_v31 = vpop.permute.xlu1 %1935 }
0x1081   :  { %2841 = vmatpush3.bf16.msra.mxu0 %v1836_v16  ;;  %v1941_v43 = vsel %vm161_vm2, %v1936_v31, 0 }
0x1082   :  { %2852 = vmatprep.subr.bf16.mxu0 %v3237_v8 }
0x1083   :  { %v3107_v19 = vpop.eup %3106 }
0x1084   :  { %v1785_v25 = vmul.f32 %v3107_v19, %v3101_v59  ;;  %v3109_v28 = vpop.eup %3108  ;;  %v1934_v60 = vpop.permute.xlu1 %1933 }
0x1085   :  { %v1782_v36 = vmul.f32 %v3109_v28, %v3099_v0  ;;  %v1883_v62 = vpop.permute.xlu0 %1882 }
0x1086   :  { %v1787_v20 = vpack.c.bf16 %v1785_v25, %v1784_v23 }
0x1087   :  { %v3111_v33 = vpop.eup %3110 }
0x1088   :  { %v1783_v38 = vmul.f32 %v3111_v33, %v3103_v9  ;;  %2843 = vmatmul.mubr.msk.bf16.vlgmr.msra.gmra.mrb[56].mxu0 %vm259_vm3, %v1787_v20 }
0x1089   :  { %2854 = vmatprep.mubr.msk.bf16.mxu0 %vm3238_vm1, %v3237_v8 }
0x108a   :  { %2853 = vmatpush3.bf16.xpose.msra.mxu0 %v1941_v43  ;;  %v1786_v53 = vpack.c.bf16 %v1783_v38, %v1782_v36 }
0x108b   :  { %2864 = vmatprep.subr.bf16.mxu0 %v3237_v8 }
0x108c   :  { %2837 = vmatmul.mubr.msk.bf16.vlgmr.msra.gmra.mrb[52].mxu1 %vm259_vm3, %v1786_v53 }
0x108d   :  { %2847 = vmatpush3.bf16.xpose.msra.mxu1 %v1890_v58  ;;  %2848 = vmatprep.mubr.msk.bf16.mxu1 %vm3238_vm1, %v3237_v8 }
0x108e   :  { %2858 = vmatprep.subr.bf16.mxu1 %v3237_v8 }
0x1091   :  { %2855 = vmatmul.mubr.msk.bf16.vlgmr.msra.gmra.mrb[60].mxu0 %vm161_vm2, %v1934_v60 }
0x1092   :  { %2866 = vmatprep.mubr.msk.bf16.mxu0 %vm3238_vm1, %v3237_v8 }
0x1094   :  { %2849 = vmatmul.mubr.msk.bf16.vlgmr.msra.gmra.mrb[56].mxu1 %vm161_vm2, %v1883_v62 }
0x1095   :  { %2860 = vmatprep.mubr.msk.bf16.mxu1 %vm3238_vm1, %v3237_v8 }
0x115b   :  { %v3692_v0 = vpop.f32.mrb[56].mxu0 }
0x115c   :  { %v2844_v59 = vpop.f32.mrb[57].mxu0 }
0x115d   :  { %v3694_v3 = vpop.f32.mrb[58].mxu0 }
0x115e   :  { %v2979_v5 = vpack.i.bf16 %v3694_v3, %v3692_v0  ;;  %v2845_v9 = vpop.f32.mrb[59].mxu0 }
0x115f   :  { %v3698_v61 = vpop.f32.mrb[52].mxu1 }
0x1160   :  { %v2838_v10 = vpop.f32.mrb[53].mxu1 }
0x1161   :  { %v3700_v11 = vpop.f32.mrb[54].mxu1 }
0x1162   :  { %v2974_v12 = vpack.i.bf16 %v3700_v11, %v3698_v61  ;;  %v2839_v13 = vpop.f32.mrb[55].mxu1 }
0x1164   :  { %v1977_v15 = vpop.f32.mrb[60].mxu0 }
0x1165   :  { %v2856_v16 = vpop.f32.mrb[61].mxu0  ;;  %v1990_v36 = vsel %vm259_vm3, %v1977_v15, -inf }
0x1166   :  { %v1980_v21 = vpop.f32.mrb[62].mxu0 }
0x1167   :  { %v1926_v19 = vpop.f32.mrb[56].mxu1  ;;  %v2857_v23 = vpop.f32.mrb[63].mxu0  ;;  %v1993_v38 = vsel %vm259_vm3, %v1980_v21, -inf }
0x1168   :  { %v2850_v25 = vpop.f32.mrb[57].mxu1  ;;  %v1984_v28 = vsel %vm259_vm3, %v1926_v19, -inf }
0x1169   :  { %1985 = vmax.xlane.f32.xlu0 %v1984_v28  ;;  %v1929_v31 = vpop.f32.mrb[58].mxu1 }
0x116a   :  { %v2851_v20 = vpop.f32.mrb[59].mxu1  ;;  %v1987_v33 = vsel %vm259_vm3, %v1929_v31, -inf }
0x116b   :  { %1988 = vmax.xlane.f32.xlu1 %v1987_v33 }
0x116d   :  { %1991 = vmax.xlane.f32.xlu0 %v1990_v36 }
0x1171   :  { %1994 = vmax.xlane.f32.xlu0 %v1993_v38 }
0x11f6   :  { %v1986_v43 = vpop.xlane.xlu0 %1985 }
0x11f7   :  { %v1996_v53 = vsub.f32 %v1926_v19, %v1986_v43 }
0x11f8   :  { %v1989_v58 = vpop.xlane.xlu1 %1988 }
0x11f9   :  { %v2000_v59 = vmul.f32 1.442695, %v1996_v53  ;;  %v1997_v9 = vsub.f32 %v1929_v31, %v1989_v58 }
0x11fa   :  { %v1992_v60 = vpop.xlane.xlu0 %1991 }
0x11fb   :  { %v1998_v62 = vsub.f32 %v1977_v15, %v1992_v60  ;;  %v2002_v23 = vmul.f32 1.442695, %v1997_v9 }
0x11fd   :  { %v2004_v10 = vmul.f32 1.442695, %v1998_v62 }
0x11fe   :  { %v1995_v13 = vpop.xlane.xlu0 %1994 }
0x11ff   :  { %3112 = vpow2.f32 %v2004_v10  ;;  %v1999_v16 = vsub.f32 %v1980_v21, %v1995_v13 }
0x1200   :  { %3114 = vpow2.f32 %v2000_v59 }
0x1201   :  { %v2006_v25 = vmul.f32 1.442695, %v1999_v16 }
0x1203   :  { %3116 = vpow2.f32 %v2006_v25 }
0x1204   :  { %3118 = vpow2.f32 %v2002_v23 }
0x1209   :  { %v3113_v28 = vpop.eup %3112 }
0x120a   :  { %v2014_v20 = vsel %vm259_vm3, %v3113_v28, 0.0  ;;  %v3115_v33 = vpop.eup %3114 }
0x120b   :  { %2015 = vadd.xlane.f32.xlu1 %v2014_v20  ;;  %v2008_v15 = vsel %vm259_vm3, %v3115_v33, 0.0 }
0x120d   :  { %v3117_v19 = vpop.eup %3116 }
0x120e   :  { %v2017_v36 = vsel %vm259_vm3, %v3117_v19, 0.0  ;;  %v3119_v31 = vpop.eup %3118 }
0x120f   :  { %2018 = vadd.xlane.f32.xlu0 %v2017_v36  ;;  %2009 = vadd.xlane.f32.xlu1 %v2008_v15  ;;  %v2011_v21 = vsel %vm259_vm3, %v3119_v31, 0.0 }
0x1213   :  { %2012 = vadd.xlane.f32.xlu0 %v2011_v21 }
0x1220   :  { %2034 = vrot.lane.b32.xlu1 %v3366_v18, %s3260_s0 }
0x1224   :  { %2925 = vrot.lane.b32.xlu1 %v2924_v35, %s3232_s16 }
0x1228   :  { %2930 = vrot.lane.b32.xlu1 %v2929_v30, %s3232_s16  ;;  %s3262_s16 = smov 16  }
0x1229   :  { %2081 = vrot.lane.b32.xlu0 %v3364_v14, %s3260_s0 }
0x122c   :  { %2940 = vrot.lane.b32.xlu1 %v2939_v45, %s3235_s28 }
0x122d   :  { %2935 = vrot.lane.b32.xlu0 %v2934_v50, %s3235_s28  ;;  %s3264_s28 = smov 24  }
0x1230   :  { %2950 = vrot.lane.b32.xlu1 %v2949_v2, %s3261_s20  ;;  %v2996_v2 = vld [vmem:[#allocation7] sm:$0xff]  }
0x1231   :  { %2945 = vrot.lane.b32.xlu0 %v2944_v7, %s3261_s20 }
0x1234   :  { %2960 = vrot.lane.b32.xlu1 %v2959_v48, %s3262_s16 }
0x1235   :  { %2955 = vrot.lane.b32.xlu0 %v2954_v55, %s3262_s16 }
0x1238   :  { %2970 = vrot.lane.b32.xlu1 %v2969_v40, %s3263_s2 }
0x1239   :  { %2965 = vrot.lane.b32.xlu0 %v2964_v57, %s3263_s2 }
0x123c   :  { %2980 = vrot.lane.b32.xlu1 %v2979_v5, %s3264_s28 }
0x123d   :  { %2975 = vrot.lane.b32.xlu0 %v2974_v12, %s3264_s28 }
0x1298   :  { %v2016_v14 = vpop.xlane.xlu1 %2015 }
0x1299   :  { %3120 = vrcp.f32 %v2016_v14 }
0x129c   :  { %v2019_v18 = vpop.xlane.xlu0 %2018  ;;  %v2010_v27 = vpop.xlane.xlu1 %2009 }
0x129d   :  { %3122 = vrcp.f32 %v2019_v18 }
0x129e   :  { %3124 = vrcp.f32 %v2010_v27 }
0x12a0   :  { %v2013_v29 = vpop.xlane.xlu0 %2012  ;;  %v2035_v30 = vpop.permute.xlu1 %2034 }
0x12a1   :  { %3126 = vrcp.f32 %v2013_v29  ;;  %2859 = vmatpush3.bf16.msra.mxu1 %v2035_v30 }
0x12a2   :  { %2870 = vmatprep.subr.bf16.mxu1 %v2996_v2 }
0x12a3   :  { %v3121_v34 = vpop.eup %3120 }
0x12a4   :  { %v2082_v32 = vpop.permute.xlu0 %2081  ;;  %v2030_v42 = vmul.f32 %v3121_v34, %v3113_v28  ;;  %v2926_v40 = vpop.permute.xlu1 %2925 }
0x12a5   :  { %2865 = vmatpush3.bf16.msra.mxu0 %v2082_v32  ;;  %v2927_v11 = vunpack.i.l.bf16 %v2926_v40  ;;  %v2928_v38 = vunpack.i.h.bf16 %v2926_v40 }
0x12a6   :  { %2878 = vmatprep.subr.bf16.mxu0 %v3237_v8 }
0x12a7   :  { %v3123_v35 = vpop.eup %3122  ;;  %v2240_v62 = vsel %vm161_vm2, %v3424_v24, %v2927_v11  ;;  %v2241_v10 = vsel %vm161_vm2, %v3426_v26, %v2928_v38 }
0x12a8   :  { %v2031_v44 = vmul.f32 %v3123_v35, %v3117_v19  ;;  %v3125_v45 = vpop.eup %3124  ;;  %v2931_v51 = vpop.permute.xlu1 %2930 }
0x12a9   :  { %v2028_v50 = vmul.f32 %v3125_v45, %v3115_v33  ;;  %v2936_v57 = vpop.permute.xlu0 %2935  ;;  %v2933_v58 = vunpack.i.h.bf16 %v2931_v51  ;;  %v2932_v60 = vunpack.i.l.bf16 %v2931_v51 }
0x12aa   :  { %v2033_v47 = vpack.c.bf16 %v2031_v44, %v2030_v42  ;;  %v2937_v43 = vunpack.i.l.bf16 %v2936_v57  ;;  %v2938_v53 = vunpack.i.h.bf16 %v2936_v57 }
0x12ab   :  { %v3127_v49 = vpop.eup %3126  ;;  %v2243_v25 = vsel %vm161_vm2, %v3422_v22, %v2933_v58  ;;  %v2242_v24 = vsel %vm161_vm2, %v3420_v17, %v2932_v60 }
0x12ac   :  { %v2029_v63 = vmul.f32 %v3127_v49, %v3119_v31  ;;  %2867 = vmatmul.mubr.msk.bf16.vlgmr.msra.gmra.mrb[64].mxu0 %vm259_vm3, %v2033_v47  ;;  %v2941_v56 = vpop.permute.xlu1 %2940  ;;  %v2245_v13 = vsel %vm2244_vm4, %v2240_v62, %v2937_v43  ;;  %v2246_v23 = vsel %vm2244_vm4, %v2241_v10, %v2938_v53 }
0x12ad   :  { %2882 = vmatprep.mubr.msk.bf16.mxu0 %vm3238_vm1, %v3237_v8  ;;  %v2946_v3 = vpop.permute.xlu0 %2945  ;;  %v2942_v59 = vunpack.i.l.bf16 %v2941_v56  ;;  %v2943_v16 = vunpack.i.h.bf16 %v2941_v56 }
0x12ae   :  { %v2032_v1 = vpack.c.bf16 %v2029_v63, %v2028_v50  ;;  %v2948_v19 = vunpack.i.h.bf16 %v2946_v3  ;;  %v2947_v31 = vunpack.i.l.bf16 %v2946_v3 }
0x12af   :  { %v2247_v26 = vsel %vm2244_vm4, %v2242_v24, %v2942_v59  ;;  %v2248_v18 = vsel %vm2244_vm4, %v2243_v25, %v2943_v16 }
0x12b0   :  { %2861 = vmatmul.mubr.msk.bf16.vlgmr.msra.gmra.mrb[60].mxu1 %vm259_vm3, %v2032_v1  ;;  %v2951_v0 = vpop.permute.xlu1 %2950 }
0x12b1   :  { %2871 = vmatpush3.bf16.msra.mxu1 %v2996_v2  ;;  %v2956_v61 = vpop.permute.xlu0 %2955  ;;  %v2953_v28 = vunpack.i.h.bf16 %v2951_v0  ;;  %v2952_v20 = vunpack.i.l.bf16 %v2951_v0 }
0x12b2   :  { %2872 = vmatprep.subr.bf16.mxu1 %v2997_v4  ;;  %v2958_v27 = vunpack.i.h.bf16 %v2956_v61  ;;  %v2957_v22 = vunpack.i.l.bf16 %v2956_v61 }
0x12b3   :  { %v2252_v32 = vsel %vm2249_vm5, %v2247_v26, %v2952_v20  ;;  %v2253_v34 = vsel %vm2249_vm5, %v2248_v18, %v2953_v28 }
0x12b4   :  { %v2961_v5 = vpop.permute.xlu1 %2960 }
0x12b5   :  { %2873 = vmatpush3.bf16.msra.mxu1 %v2997_v4  ;;  %v2966_v9 = vpop.permute.xlu0 %2965  ;;  %v2963_v36 = vunpack.i.h.bf16 %v2961_v5  ;;  %v2962_v15 = vunpack.i.l.bf16 %v2961_v5 }
0x12b6   :  { %v2968_v35 = vunpack.i.h.bf16 %v2966_v9  ;;  %v2967_v42 = vunpack.i.l.bf16 %v2966_v9 }
0x12b7   :  { %v2256_v44 = vsel %vm259_vm3, %v2252_v32, %v2962_v15  ;;  %v2257_v45 = vsel %vm259_vm3, %v2253_v34, %v2963_v36 }
0x12b8   :  { %v2971_v12 = vpop.permute.xlu1 %2970 }
0x12b9   :  { %v2973_v21 = vunpack.i.h.bf16 %v2971_v12  ;;  %v2972_v14 = vunpack.i.l.bf16 %v2971_v12  ;;  %v2976_v17 = vpop.permute.xlu0 %2975  ;;  %v2584_v12 = vld [vmem:[%s3841_s3] ss:$0 sm:$0xff] }
0x12ba   :  { %v2978_v2 = vunpack.i.h.bf16 %v2976_v17  ;;  %v2977_v4 = vunpack.i.l.bf16 %v2976_v17  ;;  %v2998_v17 = vld [vmem:[%s3844_s6] sm:$0xff]  }
0x12bb   :  { %v2261_v49 = vsel %vm2258_vm6, %v2256_v44, %v2972_v14  ;;  %v2262_v50 = vsel %vm2258_vm6, %v2257_v45, %v2973_v21  ;;  %2879 = vmatpush3.bf16.msra.mxu0 %v2998_v17 }
0x12bc   :  { %v2981_v33 = vpop.permute.xlu1 %2980  ;;  %2880 = vmatprep.subr.bf16.mxu0 %v3237_v8  ;;  %v2589_v8 = vld [vmem:[%s3842_s4] ss:$0 sm:$0xff] }
0x12bd   :  { %v2983_v29 = vunpack.i.h.bf16 %v2981_v33  ;;  %v2982_v30 = vunpack.i.l.bf16 %v2981_v33 }
0x137f   :  { %v2121_v6 = vpop.f32.mrb[64].mxu0 }
0x1380   :  { %v2868_v7 = vpop.f32.mrb[65].mxu0 }
0x1381   :  { %v2124_v41 = vpop.f32.mrb[66].mxu0  ;;  %v2267_v7 = vsel %vm2263_vm7, %v2262_v50, %v2983_v29 }
0x1382   :  { %v2989_v46 = vpack.i.bf16 %v2124_v41, %v2121_v6  ;;  %v2869_v48 = vpop.f32.mrb[67].mxu0  ;;  %v2266_v6 = vsel %vm2263_vm7, %v2261_v49, %v2982_v30  ;;  %v2250_v41 = vsel %vm2249_vm5, %v2245_v13, %v2947_v31 }
0x1383   :  { %v2074_v52 = vpop.f32.mrb[60].mxu1 }
0x1384   :  { %2990 = vrot.lane.b32.xlu1 %v2989_v46, %s3265_s23  ;;  %v2862_v54 = vpop.f32.mrb[61].mxu1  ;;  %v2251_v46 = vsel %vm2249_vm5, %v2246_v23, %v2948_v19 }
0x1385   :  { %v2077_v55 = vpop.f32.mrb[62].mxu1  ;;  %v2254_v54 = vsel %vm259_vm3, %v2250_v41, %v2957_v22 }
0x1386   :  { %v2984_v37 = vpack.i.bf16 %v2077_v55, %v2074_v52  ;;  %v2863_v39 = vpop.f32.mrb[63].mxu1  ;;  %v2255_v55 = vsel %vm259_vm3, %v2251_v46, %v2958_v27  ;;  %v2259_v40 = vsel %vm2258_vm6, %v2254_v54, %v2967_v42  ;;  %v2999_v42 = vld [vmem:[%s3844_s6 + $0x8] sm:$0xff]   ;;  %v2590_v54 = vld [vmem:[%s3843_s5] ss:$0 sm:$0xff] }
0x1387   :  { %v2260_v51 = vsel %vm2258_vm6, %v2255_v55, %v2968_v35  ;;  %v2264_v0 = vsel %vm2263_vm7, %v2259_v40, %v2977_v4  ;;  %2881 = vmatpush3.bf16.msra.mxu0 %v2999_v42 }
0x1388   :  { %2985 = vrot.lane.b32.xlu0 %v2984_v37, %s3265_s23  ;;  %v2265_v3 = vsel %vm2263_vm7, %v2260_v51, %v2978_v2 }
0x13f6   :  { %v2991_v47 = vpop.permute.xlu1 %2990 }
0x13f7   :  { %v2993_v63 = vunpack.i.h.bf16 %v2991_v47  ;;  %v2992_v1 = vunpack.i.l.bf16 %v2991_v47 }
0x13f9   :  { %v2271_v48 = vsel %vm2268_vm8, %v2266_v6, %v2992_v1  ;;  %v2272_v52 = vsel %vm2268_vm8, %v2267_v7, %v2993_v63 }
0x13fa   :  { %v2274_v37 = vpack.c.bf16 %v2272_v52, %v2271_v48  ;;  %v2986_v39 = vpop.permute.xlu0 %2985 }
0x13fb   :  { %v2988_v56 = vunpack.i.h.bf16 %v2986_v39  ;;  %v2987_v57 = vunpack.i.l.bf16 %v2986_v39 }
0x13fd   :  { %v2270_v5 = vsel %vm2268_vm8, %v2265_v3, %v2988_v56  ;;  %v2269_v61 = vsel %vm2268_vm8, %v2264_v0, %v2987_v57 }
0x13fe   :  { %v2273_v11 = vpack.c.bf16 %v2270_v5, %v2269_v61 }
0x1400   :  { %2874 = vmatprep.mubr.msk.bf16.mxu1 %vm94_vm0, %v2273_v11 }
0x1401   :  { %2875 = vmatmul.mubr.msk.bf16.vlgmr.msra.gmra.mrb[64].mxu1 %vm94_vm0, %v2274_v37 }
0x14d4   :  { %v2876_v38 = vpop.f32.mrb[64].mxu1 }
0x14d5   :  { %v2338_v43 = vpop.f32.mrb[65].mxu1  ;;  %v2347_v62 = vadd.f32 %v2876_v38, %v2584_v12 }
0x14d6   :  { %v2339_v53 = vadd.f32 %v2584_v12, %v2338_v43  ;;  %v2877_v58 = vpop.f32.mrb[66].mxu1 }
0x14d7   :  { %v2341_v60 = vpop.f32.mrb[67].mxu1  ;;  %v2350_v13 = vadd.f32 %v2877_v58, %v2584_v12  ;;  %v2359_v16 = vsel %vm94_vm0, %v2347_v62, 0.0 }
0x14d8   :  { %v2342_v59 = vadd.f32 %v2584_v12, %v2341_v60  ;;  %v2353_v9 = vsel %vm94_vm0, %v2339_v53, 0.0 }
0x14d9   :  { %2354 = vadd.xlane.f32.xlu0 %v2353_v9  ;;  %v2362_v23 = vsel %vm94_vm0, %v2350_v13, 0.0 }
0x14da   :  { %v2356_v10 = vsel %vm94_vm0, %v2342_v59, 0.0 }
0x14db   :  { %2357 = vadd.xlane.f32.xlu1 %v2356_v10 }
0x14dd   :  { %2360 = vadd.xlane.f32.xlu0 %v2359_v16 }
0x14e1   :  { %2363 = vadd.xlane.f32.xlu0 %v2362_v23 }
0x1566   :  { %v2355_v25 = vpop.xlane.xlu0 %2354 }
0x1567   :  { %v2365_v28 = vmul.f32 0.03125, %v2355_v25 }
0x1568   :  { %v2358_v20 = vpop.xlane.xlu1 %2357 }
0x1569   :  { %v2369_v33 = vsub.f32 %v2339_v53, %v2365_v28  ;;  %v2366_v24 = vmul.f32 0.03125, %v2358_v20 }
0x156a   :  { %v2361_v19 = vpop.xlane.xlu0 %2360 }
0x156b   :  { %v2370_v36 = vsub.f32 %v2342_v59, %v2366_v24  ;;  %v2367_v15 = vmul.f32 0.03125, %v2361_v19  ;;  %v2373_v31 = vmul.f32 %v2369_v33, %v2369_v33 }
0x156d   :  { %v2371_v26 = vsub.f32 %v2347_v62, %v2367_v15  ;;  %v2377_v21 = vsel %vm94_vm0, %v2373_v31, 0.0  ;;  %v2374_v14 = vmul.f32 %v2370_v36, %v2370_v36 }
0x156e   :  { %2378 = vadd.xlane.f32.xlu1 %v2377_v21  ;;  %v2364_v18 = vpop.xlane.xlu0 %2363 }
0x156f   :  { %v2368_v27 = vmul.f32 0.03125, %v2364_v18  ;;  %v2380_v29 = vsel %vm94_vm0, %v2374_v14, 0.0  ;;  %v2375_v30 = vmul.f32 %v2371_v26, %v2371_v26 }
0x1570   :  { %2381 = vadd.xlane.f32.xlu0 %v2380_v29 }
0x1571   :  { %v2372_v22 = vsub.f32 %v2350_v13, %v2368_v27  ;;  %v2383_v32 = vsel %vm94_vm0, %v2375_v30, 0.0  ;;  %v2591_v30 = vld [vmem:[%s3845_s7] ss:$0 sm:$0xff] }
0x1572   :  { %2384 = vadd.xlane.f32.xlu1 %v2383_v32 }
0x1573   :  { %v2376_v34 = vmul.f32 %v2372_v22, %v2372_v22 }
0x1575   :  { %v2386_v35 = vsel %vm94_vm0, %v2376_v34, 0.0 }
0x1576   :  { %2387 = vadd.xlane.f32.xlu0 %v2386_v35 }
0x15fb   :  { %v2379_v44 = vpop.xlane.xlu1 %2378 }
0x15fc   :  { %v2389_v45 = vmul.f32 0.03125, %v2379_v44 }
0x15fd   :  { %v2382_v47 = vpop.xlane.xlu0 %2381 }
0x15fe   :  { %v2393_v49 = vadd.f32 1e-05, %v2389_v45  ;;  %v2390_v50 = vmul.f32 0.03125, %v2382_v47 }
0x15ff   :  { %v2385_v63 = vpop.xlane.xlu1 %2384 }
0x1600   :  { %3128 = vrsqrt.f32 %v2393_v49  ;;  %v2394_v1 = vadd.f32 1e-05, %v2390_v50  ;;  %v2391_v2 = vmul.f32 0.03125, %v2385_v63 }
0x1602   :  { %3130 = vrsqrt.f32 %v2394_v1  ;;  %v2395_v4 = vadd.f32 1e-05, %v2391_v2 }
0x1603   :  { %v2388_v6 = vpop.xlane.xlu0 %2387 }
0x1604   :  { %3132 = vrsqrt.f32 %v2395_v4  ;;  %v2392_v7 = vmul.f32 0.03125, %v2388_v6 }
0x1606   :  { %v2396_v41 = vadd.f32 1e-05, %v2392_v7 }
0x1608   :  { %3134 = vrsqrt.f32 %v2396_v41 }
0x160a   :  { %v3129_v46 = vpop.eup %3128 }
0x160b   :  { %v2401_v48 = vmul.f32 %v3129_v46, %v2369_v33 }
0x160c   :  { %v3131_v52 = vpop.eup %3130 }
0x160d   :  { %v2412_v55 = vmul.f32 %v2589_v8, %v2401_v48  ;;  %v2402_v37 = vmul.f32 %v3131_v52, %v2370_v36 }
0x160e   :  { %v3133_v39 = vpop.eup %3132 }
0x160f   :  { %v2423_v40 = vadd.f32 %v2590_v54, %v2412_v55  ;;  %v2413_v51 = vmul.f32 %v2589_v8, %v2402_v37  ;;  %v2403_v56 = vmul.f32 %v3133_v39, %v2371_v26 }
0x1611   :  { %v2424_v57 = vadd.f32 %v2590_v54, %v2413_v51  ;;  %v2414_v0 = vmul.f32 %v2589_v8, %v2403_v56  ;;  %v2427_v5 = vsel %vm94_vm0, %v2423_v40, 0.0 }
0x1612   :  { %v3135_v3 = vpop.eup %3134 }
0x1613   :  { %v2428_v61 = vsel %vm94_vm0, %v2424_v57, 0.0  ;;  %v2404_v11 = vmul.f32 %v3135_v3, %v2372_v22  ;;  %v2425_v38 = vadd.f32 %v2590_v54, %v2414_v0 }
0x1614   :  { %v2429_v12 = vadd.f32 %v2428_v61, %v2427_v5 }
0x1615   :  { %v2415_v43 = vmul.f32 %v2589_v8, %v2404_v11  ;;  %v2436_v62 = vsel %vm94_vm0, %v2425_v38, 0.0 }
0x1616   :  { %v2430_v53 = vrot.slane %v2429_v12, 4 }
0x1617   :  { %v2426_v58 = vadd.f32 %v2590_v54, %v2415_v43 }
0x1618   :  { %v2431_v60 = vadd.f32 %v2430_v53, %v2429_v12 }
0x1619   :  { %v2437_v59 = vsel %vm94_vm0, %v2426_v58, 0.0 }
0x161a   :  { %v2432_v9 = vrot.slane %v2431_v60, 2  ;;  %v2438_v10 = vadd.f32 %v2437_v59, %v2436_v62 }
0x161c   :  { %v2439_v13 = vrot.slane %v2438_v10, 4  ;;  %v2433_v16 = vadd.f32 %v2432_v9, %v2431_v60 }
0x161e   :  { %v2440_v23 = vadd.f32 %v2439_v13, %v2438_v10  ;;  %v2434_v25 = vrot.slane %v2433_v16, 1 }
0x1620   :  { %v2441_v28 = vrot.slane %v2440_v23, 2  ;;  %v2435_v20 = vadd.f32 %v2434_v25, %v2433_v16 }
0x1622   :  { %v2442_v33 = vadd.f32 %v2441_v28, %v2440_v23  ;;  %v2445_v19 = vmul.f32 0.0625, %v2435_v20 }
0x1624   :  { %v2443_v24 = vrot.slane %v2442_v33, 1  ;;  %v2447_v31 = vpack.c.bf16 %v2445_v19, %v2445_v19 }
0x1626   :  { %v2444_v36 = vadd.f32 %v2443_v24, %v2442_v33  ;;  %v2462_v14 = vunpack.c.l.b16 %v2447_v31 }
0x1628   :  { %v2446_v15 = vmul.f32 0.0625, %v2444_v36 }
0x162a   :  { %v2448_v26 = vpack.c.bf16 %v2446_v15, %v2446_v15  ;;  %v2524_v21 = vsel %vm2464_vm9, %v2446_v15, %v2445_v19 }
0x162c   :  { %v2463_v18 = vunpack.c.l.b16 %v2448_v26 }
0x162e   :  { %v2465_v27 = vsel %vm2464_vm9, %v2463_v18, %v2462_v14 }
0x162f   :  { %v2466_v29 = vpack.c.b16 %v2465_v27, %v2465_v27 }
0x1631   :  { %2883 = vmatmul.mubr.msk.bf16.vlgmr.msra.gmra.mrb[68].mxu0 %vm94_vm0, %v2466_v29 }
0x1704   :  { %v2516_v22 = vpop.f32.mrb[68].mxu0 }
0x1705   :  { %v2517_v32 = vadd.f32 %v2591_v30, %v2516_v22  ;;  %v2884_v34 = vpop.f32.mrb[69].mxu0 }
0x1706   :  { %v2519_v35 = vpop.f32.mrb[70].mxu0 }
0x1707   :  { %2527 = vrot.lane.b32.xlu1 %v2517_v32, %s3266_s9  ;;  %v2885_v17 = vpop.f32.mrb[71].mxu0 }
0x1779   :  { %v2528_v42 = vpop.permute.xlu1 %2527 }
0x177a   :  { %v2530_v44 = vsel %vm94_vm0, %v2524_v21, %v2528_v42 }
0x177b   :  { %2531 = vst [vmem:[#allocation8] sm:$0x3] %v2530_v44 }
0x177c   :  { %3213 = shalt.err (!%p3210_p0)
}
0x177d   :  { %s3214_s14 = scalar_lea.hbm %s3846_s8, 32 }
0x177e   :  { %p3215_p1 = scmp.ne.s32.totalorder %s3846_s8, %s3214_s14  ;;  %p3218_p2 = scmp.lt.u32.totalorder %s3214_s14, %s3846_s8 }
0x1780   :  { %p3220_p3 = pnand %p3218_p2, %p3215_p1 }
0x1782   :  { %3223 = shalt.err (!%p3220_p3)
}
0x1783   :  { %2541 = dma.vmem_to_hbm [thread:$0]  %s2539_s11, 32, %s3846_s8, [#allocation4]  }
0x1784   :  { %3228 = dma.done.wait [#allocation4], 32  }
0x1785   :  { %3229 = vsyncadd [#allocation4], 4294967264 }
0x1786   :  { %2545 = vsyncpa [#allocation3], 1 }
0x1787   :  { %2546 = vsyncpa [#allocation6], 1 }
0x1788   :  { %2547 = vsyncpa [#allocation4], 1 }

</bundles_post_ra>
